<compile_context>
chip_gen: v5e
topology: v5e:2x2
jax: 0.10.0
libtpu: 0.0.40
codegen_flags: <defaults>
</compile_context>

<pallas_src>
import functools
import math

import jax
import jax.numpy as jnp
from jax.experimental import pallas as pl
from jax.experimental.pallas import tpu as pltpu

LN_EPS = 1e-6


# --------------------------------------------------------------------------
# Generation-aware configuration
# --------------------------------------------------------------------------

def _device_kind():
    try:
        return jax.devices()[0].device_kind.lower()
    except Exception:
        return ""


_KIND = _device_kind()
_IS_V7 = "v7" in _KIND
_IS_V5E = ("v5e" in _KIND) or ("v5 lite" in _KIND) or ("v5litepod" in _KIND)

# v7x has 64 MiB VMEM per TensorCore -> keep a tight scoped budget; v5e/v6e have 128 MiB.
VMEM_LIMIT_BYTES = (32 if _IS_V7 else 64) * 1024 * 1024
TILE_M = 256 if _IS_V7 else 512      # row tile for LN+QKV and out-proj+FFN kernels
TILE_Q = 256                         # query tile for flash attention
TILE_KV = 512 if _IS_V7 else 1024    # key/value tile for flash attention
TILE_FF = 512 if _IS_V7 else 1024    # d_ff tile for the FFN inner dimension


def _probe_pipeline_mode(buffer_count):
    """Check whether BlockSpec(pipeline_mode=pl.Buffered(n)) works on this jax/TPU."""
    def _k(x_ref, o_ref):
        o_ref[...] = x_ref[...] + 1.0

    try:
        fn = pl.pallas_call(
            _k,
            out_shape=jax.ShapeDtypeStruct((8, 128), jnp.float32),
            grid=(2,),
            in_specs=[pl.BlockSpec((8, 128), lambda i: (0, 0),
                                   pipeline_mode=pl.Buffered(buffer_count))],
            out_specs=pl.BlockSpec((8, 128), lambda i: (0, 0)),
        )
        jax.block_until_ready(fn(jnp.zeros((8, 128), jnp.float32)))
        return True
    except Exception:
        return False


_BUFFERED_1_OK = _probe_pipeline_mode(1)                      # single-buffer resident weights
_BUFFERED_KV = 3 if (_IS_V5E and _probe_pipeline_mode(3)) else None   # deeper K/V buffers on v5e


def _resident_spec(block_shape, index_map):
    """Spec for weights whose block index never changes: single-buffer if supported."""
    if _BUFFERED_1_OK:
        return pl.BlockSpec(block_shape, index_map, pipeline_mode=pl.Buffered(1))
    return pl.BlockSpec(block_shape, index_map)


def _kv_spec(block_shape, index_map):
    """K/V tile spec: deeper buffering on v5e (lowest HBM BW) when supported."""
    if _BUFFERED_KV is not None:
        return pl.BlockSpec(block_shape, index_map, pipeline_mode=pl.Buffered(_BUFFERED_KV))
    return pl.BlockSpec(block_shape, index_map)


def _pick_tile(total, preferred):
    """Largest divisor of `total` that is <= `preferred` (keeps blocks exact)."""
    if total <= preferred:
        return total
    for t in range(preferred, 0, -1):
        if total % t == 0:
            return t
    return total


def _layernorm_f32(x, gamma, beta, eps):
    # Matches the Annotated-Transformer LayerNorm: unbiased std, (std + eps) denom.
    d = x.shape[-1]
    mean = jnp.mean(x, axis=-1, keepdims=True)
    diff = x - mean
    var = jnp.sum(diff * diff, axis=-1, keepdims=True) * (1.0 / (d - 1))
    return gamma * diff / (jnp.sqrt(var) + eps) + beta


# --------------------------------------------------------------------------
# Kernel 1: fused LN1 + packed Q/K/V projection (scale folded into Q weights)
# --------------------------------------------------------------------------

def ln_qkv_kernel(x_ref, g_ref, b_ref, wqkv_ref, bqkv_ref, q_ref, k_ref, v_ref, *, eps):
    x = x_ref[...].astype(jnp.float32)                       # [tm, D]
    d = x.shape[-1]
    xn = _layernorm_f32(x, g_ref[...], b_ref[...], eps)      # f32
    qkv = jnp.dot(xn.astype(jnp.bfloat16), wqkv_ref[...],
                  preferred_element_type=jnp.float32) + bqkv_ref[...]   # [tm, 3D] f32
    q_ref[...] = qkv[:, :d].astype(q_ref.dtype)
    k_ref[...] = qkv[:, d:2 * d].astype(k_ref.dtype)
    v_ref[...] = qkv[:, 2 * d:].astype(v_ref.dtype)


def ln_qkv_proj(x2d, gamma, beta, wqkv, bqkv, *, tile_m=TILE_M, eps=LN_EPS):
    # TODO(synk): for very large D (>= 2048 on v7x) the 3D output axis should also be
    # tiled so wqkv residency stays bounded; untiled here since D is modest.
    M, D = x2d.shape
    tm = _pick_tile(M, tile_m)
    sds = jax.ShapeDtypeStruct((M, D), jnp.bfloat16)
    return pl.pallas_call(
        functools.partial(ln_qkv_kernel, eps=eps),
        out_shape=(sds, sds, sds),
        grid=(M // tm,),
        in_specs=[
            pl.BlockSpec((tm, D), lambda i: (i, 0)),
            pl.BlockSpec((1, D), lambda i: (0, 0)),
            pl.BlockSpec((1, D), lambda i: (0, 0)),
            _resident_spec((D, 3 * D), lambda i: (0, 0)),    # VMEM-resident, single-buffered
            pl.BlockSpec((1, 3 * D), lambda i: (0, 0)),
        ],
        out_specs=(
            pl.BlockSpec((tm, D), lambda i: (i, 0)),
            pl.BlockSpec((tm, D), lambda i: (i, 0)),
            pl.BlockSpec((tm, D), lambda i: (i, 0)),
        ),
        compiler_params=pltpu.CompilerParams(
            dimension_semantics=("parallel",),
            vmem_limit_bytes=VMEM_LIMIT_BYTES),
    )(x2d, gamma.reshape(1, D), beta.reshape(1, D), wqkv, bqkv)


# --------------------------------------------------------------------------
# Kernel 2: flash attention, q-tiled; heads on the grid when dk % 128 == 0
# --------------------------------------------------------------------------

def flash_attn_kernel(kvmask_ref, q_ref, k_ref, v_ref, o_ref,
                      m_sc, l_sc, acc_sc, *, num_heads, kv_axis):
    kv_idx = pl.program_id(kv_axis)

    @pl.when(kv_idx == 0)
    def _init():
        m_sc[...] = jnp.full(m_sc.shape, -jnp.inf, jnp.float32)
        l_sc[...] = jnp.zeros(l_sc.shape, jnp.float32)
        acc_sc[...] = jnp.zeros(acc_sc.shape, jnp.float32)

    # additive bias from key-valid mask (1.0 keep / 0.0 masked); hoisted over heads
    valid = kvmask_ref[0]                                    # [1, tkv] f32
    bias = jnp.where(valid == 0.0, jnp.float32(-1e9), jnp.float32(0.0))

    dk = q_ref.shape[-1] // num_heads
    # 1/sqrt(dk) is already folded into the Q projection (prepare_params), so
    # there is no per-score scale multiply here.
    for h in range(num_heads):                 # num_heads == 1 when heads are on the grid
        sl = slice(h * dk, (h + 1) * dk)
        qh = q_ref[0, :, sl]                                 # [tq,  dk] bf16
        kh = k_ref[0, :, sl]                                 # [tkv, dk] bf16
        vh = v_ref[0, :, sl]                                 # [tkv, dk] bf16
        s = jax.lax.dot_general(qh, kh, (((1,), (1,)), ((), ())),
                                preferred_element_type=jnp.float32)     # [tq, tkv]
        s = s + bias                                         # f32 masking
        m_prev = m_sc[h]                                     # [tq, 1]
        m_new = jnp.maximum(m_prev, jnp.max(s, axis=-1, keepdims=True))
        alpha = jnp.exp(m_prev - m_new)
        p = jnp.exp(s - m_new)                               # [tq, tkv] f32
        l_sc[h] = alpha * l_sc[h] + jnp.sum(p, axis=-1, keepdims=True)
        pv = jnp.dot(p.astype(jnp.bfloat16), vh, preferred_element_type=jnp.float32)
        acc_sc[:, sl] = alpha * acc_sc[:, sl] + pv
        m_sc[h] = m_new

    @pl.when(kv_idx == pl.num_programs(kv_axis) - 1)
    def _finalize():
        for h in range(num_heads):
            sl = slice(h * dk, (h + 1) * dk)
            inv_l = pl.reciprocal(l_sc[h], approx=True)      # EUP slot (free-ish)
            acc_sc[:, sl] = acc_sc[:, sl] * inv_l
        o_ref[0] = acc_sc[...].astype(o_ref.dtype)           # single lane-dense store


def flash_attention(q, k, v, key_valid, *, num_heads, tile_q=TILE_Q, tile_kv=TILE_KV):
    B, S, D = q.shape
    dk = D // num_heads
    tq = _pick_tile(S, tile_q)
    tkv = _pick_tile(S, tile_kv)
    kvmask = key_valid.reshape(B, 1, S)

    if dk % 128 == 0:
        # Heads become a "parallel" grid axis: no in-kernel head loop, per-head
        # lane-dense tiles, scratch bounded by one head.
        grid = (B, num_heads, S // tq, S // tkv)
        in_specs = [
            pl.BlockSpec((1, 1, tkv), lambda b, h, qi, kv: (b, 0, kv)),
            pl.BlockSpec((1, tq, dk), lambda b, h, qi, kv: (b, qi, h)),
            _kv_spec((1, tkv, dk), lambda b, h, qi, kv: (b, kv, h)),
            _kv_spec((1, tkv, dk), lambda b, h, qi, kv: (b, kv, h)),
        ]
        out_spec = pl.BlockSpec((1, tq, dk), lambda b, h, qi, kv: (b, qi, h))
        scratch = [pltpu.VMEM((1, tq, 1), jnp.float32),      # running max
                   pltpu.VMEM((1, tq, 1), jnp.float32),      # running denominator
                   pltpu.VMEM((tq, dk), jnp.float32)]        # running numerator
        kern = functools.partial(flash_attn_kernel, num_heads=1, kv_axis=3)
        sems = ("parallel", "parallel", "parallel", "arbitrary")
    else:
        # TODO(synk): dk < 128 -> heads handled by a static in-kernel loop over the
        # packed [tq, D] layout (per-head scratch stores are lane-masked).
        grid = (B, S // tq, S // tkv)
        in_specs = [
            pl.BlockSpec((1, 1, tkv), lambda b, qi, kv: (b, 0, kv)),
            pl.BlockSpec((1, tq, D), lambda b, qi, kv: (b, qi, 0)),
            _kv_spec((1, tkv, D), lambda b, qi, kv: (b, kv, 0)),
            _kv_spec((1, tkv, D), lambda b, qi, kv: (b, kv, 0)),
        ]
        out_spec = pl.BlockSpec((1, tq, D), lambda b, qi, kv: (b, qi, 0))
        scratch = [pltpu.VMEM((num_heads, tq, 1), jnp.float32),
                   pltpu.VMEM((num_heads, tq, 1), jnp.float32),
                   pltpu.VMEM((tq, D), jnp.float32)]
        kern = functools.partial(flash_attn_kernel, num_heads=num_heads, kv_axis=2)
        sems = ("parallel", "parallel", "arbitrary")

    return pl.pallas_call(
        kern,
        out_shape=jax.ShapeDtypeStruct((B, S, D), jnp.bfloat16),
        grid=grid,
        in_specs=in_specs,
        out_specs=out_spec,
        scratch_shapes=scratch,
        compiler_params=pltpu.CompilerParams(
            dimension_semantics=sems,
            vmem_limit_bytes=VMEM_LIMIT_BYTES),
    )(kvmask, q, k, v)


# --------------------------------------------------------------------------
# Kernel 3: out-projection + residual + LN2 + FFN (d_ff tiled) + residual
# --------------------------------------------------------------------------

def outproj_ln_ffn_kernel(a_ref, x_ref, g_ref, bt_ref, wo_ref, bo_ref,
                          w1_ref, b1_ref, w2_ref, b2_ref, o_ref,
                          x1_sc, xn_sc, y_sc, *, eps):
    j = pl.program_id(1)                                      # d_ff tile index

    @pl.when(j == 0)
    def _prologue():
        # Sublayer-0 epilogue: attention out-projection + residual (f32), then LN2.
        x1 = (jnp.dot(a_ref[...], wo_ref[...], preferred_element_type=jnp.float32)
              + bo_ref[...] + x_ref[...].astype(jnp.float32))                # [tm, D]
        x1_sc[...] = x1
        xn_sc[...] = _layernorm_f32(x1, g_ref[...], bt_ref[...], eps).astype(jnp.bfloat16)
        y_sc[...] = jnp.zeros_like(y_sc)

    # FFN partial: y += relu(xn @ w1[:, j-tile] + b1[j-tile]) @ w2[j-tile, :]
    hid = jnp.dot(xn_sc[...], w1_ref[...],
                  preferred_element_type=jnp.float32) + b1_ref[...]          # [tm, tf]
    hid = jnp.maximum(hid, 0.0)
    y_sc[...] = y_sc[...] + jnp.dot(hid.astype(jnp.bfloat16), w2_ref[...],
                                    preferred_element_type=jnp.float32)

    @pl.when(j == pl.num_programs(1) - 1)
    def _epilogue():
        o_ref[...] = (y_sc[...] + b2_ref[...] + x1_sc[...]).astype(o_ref.dtype)


def outproj_ln_ffn(attn2d, x2d, gamma, beta, wo, bo, w1, b1, w2, b2,
                   *, tile_m=TILE_M, tile_ff=TILE_FF, eps=LN_EPS):
    M, D = x2d.shape
    dff = w1.shape[1]
    tm = _pick_tile(M, tile_m)
    tf = _pick_tile(dff, tile_ff)
    return pl.pallas_call(
        functools.partial(outproj_ln_ffn_kernel, eps=eps),
        out_shape=jax.ShapeDtypeStruct((M, D), x2d.dtype),
        grid=(M // tm, dff // tf),
        in_specs=[
            pl.BlockSpec((tm, D), lambda i, j: (i, 0)),      # attention output (bf16)
            pl.BlockSpec((tm, D), lambda i, j: (i, 0)),      # residual x (f32)
            pl.BlockSpec((1, D), lambda i, j: (0, 0)),       # LN2 gamma
            pl.BlockSpec((1, D), lambda i, j: (0, 0)),       # LN2 beta
            _resident_spec((D, D), lambda i, j: (0, 0)),     # wo (bf16, single-buffered)
            pl.BlockSpec((1, D), lambda i, j: (0, 0)),       # bo
            pl.BlockSpec((D, tf), lambda i, j: (0, j)),      # w1 tile (pipelined over j)
            pl.BlockSpec((1, tf), lambda i, j: (0, j)),      # b1 tile
            pl.BlockSpec((tf, D), lambda i, j: (j, 0)),      # w2 tile (pipelined over j)
            pl.BlockSpec((1, D), lambda i, j: (0, 0)),       # b2
        ],
        out_specs=pl.BlockSpec((tm, D), lambda i, j: (i, 0)),
        scratch_shapes=[
            pltpu.VMEM((tm, D), jnp.float32),                # x1 (post-attn residual)
            pltpu.VMEM((tm, D), jnp.bfloat16),               # LN2(x1) as MXU operand
            pltpu.VMEM((tm, D), jnp.float32),                # FFN output accumulator
        ],
        compiler_params=pltpu.CompilerParams(
            dimension_semantics=("parallel", "arbitrary"),
            vmem_limit_bytes=VMEM_LIMIT_BYTES),
    )(attn2d, x2d, gamma.reshape(1, D), beta.reshape(1, D),
      wo, bo.reshape(1, D), w1, b1.reshape(1, dff), w2, b2.reshape(1, D))


# --------------------------------------------------------------------------
# Parameter preparation (one-time; hoisted out of the forward pass)
# --------------------------------------------------------------------------

def prepare_params(params, num_heads):
    """Pack Q/K/V weights, fold 1/sqrt(dk) into Q, and cast matmul weights to bf16."""
    D = params["wq"].shape[0]
    dk = D // num_heads
    scale = 1.0 / math.sqrt(dk)
    wqkv = jnp.concatenate([params["wq"] * scale, params["wk"], params["wv"]],
                           axis=1).astype(jnp.bfloat16)                      # [D, 3D]
    bqkv = jnp.concatenate([params["bq"] * scale, params["bk"], params["bv"]],
                           axis=0).astype(jnp.float32).reshape(1, 3 * D)
    prepared = dict(params)
    prepared.update(
        wqkv=wqkv,
        bqkv=bqkv,
        wo_bf16=params["wo"].astype(jnp.bfloat16),
        w1_bf16=params["w1"].astype(jnp.bfloat16),
        w2_bf16=params["w2"].astype(jnp.bfloat16),
    )
    return prepared


# --------------------------------------------------------------------------
# EncoderLayer forward
# --------------------------------------------------------------------------

@functools.partial(jax.jit, static_argnames=("num_heads",))
def encoder_layer_forward(x, key_valid, params, *, num_heads):
    """x: [B, S, D] f32; key_valid: [B, S] f32 (1.0 = attend, 0.0 = padded key).

    key_valid is the encoder padding mask, equivalent to the PyTorch [B,1,1,S]
    broadcast mask used in `scores.masked_fill(mask == 0, -1e9)`.
    `params` must come from prepare_params().
    """
    B, S, D = x.shape
    M = B * S
    x2d = x.reshape(M, D)

    # ---- Sublayer 0: x + self_attn(LN1(x), LN1(x), LN1(x), mask) ----
    q2d, k2d, v2d = ln_qkv_proj(x2d, params["ln1_g"], params["ln1_b"],
                                params["wqkv"], params["bqkv"])

    attn = flash_attention(q2d.reshape(B, S, D), k2d.reshape(B, S, D),
                           v2d.reshape(B, S, D), key_valid, num_heads=num_heads)

    # ---- out-proj + residual fused with Sublayer 1: x1 + feed_forward(LN2(x1)) ----
    out2d = outproj_ln_ffn(attn.reshape(M, D), x2d,
                           params["ln2_g"], params["ln2_b"],
                           params["wo_bf16"], params["bo"],
                           params["w1_bf16"], params["b1"],
                           params["w2_bf16"], params["b2"])
    return out2d.reshape(B, S, D)


def init_params(key, d_model, d_ff):
    ks = jax.random.split(key, 6)
    scale = 0.02

    def w(k, shape):
        return (scale * jax.random.normal(k, shape)).astype(jnp.float32)

    return {
        "ln1_g": jnp.ones((d_model,), jnp.float32),
        "ln1_b": jnp.zeros((d_model,), jnp.float32),
        "ln2_g": jnp.ones((d_model,), jnp.float32),
        "ln2_b": jnp.zeros((d_model,), jnp.float32),
        "wq": w(ks[0], (d_model, d_model)), "bq": jnp.zeros((d_model,), jnp.float32),
        "wk": w(ks[1], (d_model, d_model)), "bk": jnp.zeros((d_model,), jnp.float32),
        "wv": w(ks[2], (d_model, d_model)), "bv": jnp.zeros((d_model,), jnp.float32),
        "wo": w(ks[3], (d_model, d_model)), "bo": jnp.zeros((d_model,), jnp.float32),
        "w1": w(ks[4], (d_model, d_ff)),    "b1": jnp.zeros((d_ff,), jnp.float32),
        "w2": w(ks[5], (d_ff, d_model)),    "b2": jnp.zeros((d_model,), jnp.float32),
    }


def _reference_forward(x, key_valid, params, num_heads, eps=LN_EPS):
    """Pure-jnp f32 reference of the same EncoderLayer forward (eval mode)."""
    B, S, D = x.shape
    dk = D // num_heads

    def ln(t, g, b):
        mean = t.mean(-1, keepdims=True)
        var = ((t - mean) ** 2).sum(-1, keepdims=True) / (D - 1)
        return g * (t - mean) / (jnp.sqrt(var) + eps) + b

    xn = ln(x, params["ln1_g"], params["ln1_b"])
    q = xn @ params["wq"] + params["bq"]
    k = xn @ params["wk"] + params["bk"]
    v = xn @ params["wv"] + params["bv"]

    def split(t):
        return t.reshape(B, S, num_heads, dk).transpose(0, 2, 1, 3)

    scores = jnp.einsum("bhqd,bhkd->bhqk", split(q), split(k)) / math.sqrt(dk)
    scores = jnp.where(key_valid[:, None, None, :] == 0.0, -1e9, scores)
    p = jax.nn.softmax(scores, axis=-1)
    a = jnp.einsum("bhqk,bhkd->bhqd", p, split(v)).transpose(0, 2, 1, 3).reshape(B, S, D)
    x1 = x + a @ params["wo"] + params["bo"]
    ff = jnp.maximum(ln(x1, params["ln2_g"], params["ln2_b"]) @ params["w1"]
                     + params["b1"], 0.0) @ params["w2"] + params["b2"]
    return x1 + ff


if __name__ == "__main__":
    B, S, D, H, D_FF = 2, 8, 32, 4, 64

    key = jax.random.PRNGKey(0)
    kx, kp = jax.random.split(key)
    x = jax.random.normal(kx, (B, S, D), dtype=jnp.float32)

    # padding-style key mask: batch 0 attends to all S keys, batch 1 masks last 2
    key_valid = jnp.array([[1.0] * S, [1.0] * (S - 2) + [0.0] * 2], dtype=jnp.float32)

    params = init_params(kp, D, D_FF)
    prepared = prepare_params(params, num_heads=H)   # one-time packing / bf16 casts

    out = encoder_layer_forward(x, key_valid, prepared, num_heads=H)
    jax.block_until_ready(out)
    assert out.shape == (B, S, D) and out.dtype == jnp.float32

    ref = _reference_forward(x, key_valid, params, H)
    assert jnp.allclose(out, ref, rtol=5e-2, atol=5e-2), \
        f"max abs err = {float(jnp.max(jnp.abs(out - ref)))}"
    print("KERNEL_OK")
</pallas_src>

<mosaic_0001>
module attributes {stable_mosaic.version = 11 : i64} {
  func.func @_k(%arg0: i32, %arg1: memref<8x128xf32, #tpu.memory_space<vmem>>, %arg2: memref<8x128xf32, #tpu.memory_space<vmem>>) attributes {dimension_semantics = [#tpu.dimension_semantics<arbitrary>], iteration_bounds = array<i64: 2>, scalar_prefetch = 0 : i64, scratch_operands = 0 : i64, tpu.core_type = #tpu.core_type<tc>, window_params = [{pipeline_mode = #tpu.pipeline_mode<synchronous>, transform_indices = @transform_0, window_bounds = array<i64: 8, 128>}, {pipeline_mode = #tpu.pipeline_mode<synchronous>, transform_indices = @transform_1, window_bounds = array<i64: 8, 128>}]} {
    %c0 = arith.constant 0 : index
    %c0_0 = arith.constant 0 : index
    %0 = vector.load %arg1[%c0, %c0_0] : memref<8x128xf32, #tpu.memory_space<vmem>>, vector<8x128xf32>
    %cst = arith.constant 1.000000e+00 : f32
    %1 = vector.broadcast %cst : f32 to vector<8x128xf32>
    %2 = arith.addf %0, %1 : vector<8x128xf32>
    %c0_1 = arith.constant 0 : index
    %c0_2 = arith.constant 0 : index
    %3 = vector.load %arg2[%c0_1, %c0_2] : memref<8x128xf32, #tpu.memory_space<vmem>>, vector<8x128xf32>
    tpu.vector_store %arg2[%c0_1, %c0_2], %2 {strides = array<i32>} : memref<8x128xf32, #tpu.memory_space<vmem>>, vector<8x128xf32>,
    return
  }
  func.func @transform_0(%arg0: i32) -> (i32, i32) {
    %c0_i32 = arith.constant 0 : i32
    %c0_i32_0 = arith.constant 0 : i32
    %c0_i32_1 = arith.constant 0 : i32
    return %c0_i32, %c0_i32_0 : i32, i32
  }
  func.func @transform_1(%arg0: i32) -> (i32, i32) {
    %c0_i32 = arith.constant 0 : i32
    %c0_i32_0 = arith.constant 0 : i32
    %c0_i32_1 = arith.constant 0 : i32
    return %c0_i32, %c0_i32_0 : i32, i32
  }
}

module attributes {stable_mosaic.version = 11 : i64} {
  func.func @outproj_ln_ffn_kernel(%arg0: i32, %arg1: i32, %arg2: memref<16x32xbf16, #tpu.memory_space<vmem>>, %arg3: memref<16x32xf32, #tpu.memory_space<vmem>>, %arg4: memref<1x32xf32, #tpu.memory_space<vmem>>, %arg5: memref<1x32xf32, #tpu.memory_space<vmem>>, %arg6: memref<32x32xbf16, #tpu.memory_space<vmem>>, %arg7: memref<1x32xf32, #tpu.memory_space<vmem>>, %arg8: memref<32x64xbf16, #tpu.memory_space<vmem>>, %arg9: memref<1x64xf32, #tpu.memory_space<vmem>>, %arg10: memref<64x32xbf16, #tpu.memory_space<vmem>>, %arg11: memref<1x32xf32, #tpu.memory_space<vmem>>, %arg12: memref<16x32xf32, #tpu.memory_space<vmem>>, %arg13: memref<16x32xf32, #tpu.memory_space<vmem>>, %arg14: memref<16x32xbf16, #tpu.memory_space<vmem>>, %arg15: memref<16x32xf32, #tpu.memory_space<vmem>>) attributes {dimension_semantics = [#tpu.dimension_semantics<parallel>, #tpu.dimension_semantics<arbitrary>], iteration_bounds = array<i64: 1, 1>, scalar_prefetch = 0 : i64, scratch_operands = 3 : i64, tpu.core_type = #tpu.core_type<tc>, window_params = [{transform_indices = @transform_0, window_bounds = array<i64: 16, 32>}, {transform_indices = @transform_1, window_bounds = array<i64: 16, 32>}, {pipeline_mode = #tpu.pipeline_mode<synchronous>, transform_indices = @transform_2, window_bounds = array<i64: 1, 32>}, {pipeline_mode = #tpu.pipeline_mode<synchronous>, transform_indices = @transform_3, window_bounds = array<i64: 1, 32>}, {pipeline_mode = #tpu.pipeline_mode<synchronous>, transform_indices = @transform_4, window_bounds = array<i64: 32, 32>}, {pipeline_mode = #tpu.pipeline_mode<synchronous>, transform_indices = @transform_5, window_bounds = array<i64: 1, 32>}, {transform_indices = @transform_6, window_bounds = array<i64: 32, 64>}, {transform_indices = @transform_7, window_bounds = array<i64: 1, 64>}, {transform_indices = @transform_8, window_bounds = array<i64: 64, 32>}, {pipeline_mode = #tpu.pipeline_mode<synchronous>, transform_indices = @transform_9, window_bounds = array<i64: 1, 32>}, {transform_indices = @transform_10, window_bounds = array<i64: 16, 32>}]} {
    %c0_i32 = arith.constant 0 : i32
    %0 = arith.cmpi eq, %arg1, %c0_i32 : i32
    %1 = arith.extui %0 : i1 to i32
    %c0_i32_0 = arith.constant 0 : i32
    %2 = arith.cmpi ne, %1, %c0_i32_0 : i32
    scf.if %2 {
      %c0_16 = arith.constant 0 : index
      %c0_17 = arith.constant 0 : index
      %20 = vector.load %arg2[%c0_16, %c0_17] : memref<16x32xbf16, #tpu.memory_space<vmem>>, vector<16x32xbf16>
      %c0_18 = arith.constant 0 : index
      %c0_19 = arith.constant 0 : index
      %21 = vector.load %arg6[%c0_18, %c0_19] : memref<32x32xbf16, #tpu.memory_space<vmem>>, vector<32x32xbf16>
      %cst_20 = arith.constant dense<0.000000e+00> : vector<16x32xf32>
      %22 = tpu.matmul %20, %21, %cst_20 {dimension_numbers = #tpu.dot_dimension_numbers<[1], [0], [0], [1], [0, 0, 1, 1], [], []>} : vector<16x32xbf16>, vector<32x32xbf16>, vector<16x32xf32> -> vector<16x32xf32>
      %c0_21 = arith.constant 0 : index
      %c0_22 = arith.constant 0 : index
      %23 = vector.load %arg7[%c0_21, %c0_22] : memref<1x32xf32, #tpu.memory_space<vmem>>, vector<1x32xf32>
      %24 = vector.broadcast %23 : vector<1x32xf32> to vector<16x32xf32>
      %25 = arith.addf %22, %24 : vector<16x32xf32>
      %c0_23 = arith.constant 0 : index
      %c0_24 = arith.constant 0 : index
      %26 = vector.load %arg3[%c0_23, %c0_24] : memref<16x32xf32, #tpu.memory_space<vmem>>, vector<16x32xf32>
      %27 = arith.addf %25, %26 : vector<16x32xf32>
      %c0_25 = arith.constant 0 : index
      %c0_26 = arith.constant 0 : index
      %28 = vector.load %arg13[%c0_25, %c0_26] : memref<16x32xf32, #tpu.memory_space<vmem>>, vector<16x32xf32>
      tpu.vector_store %arg13[%c0_25, %c0_26], %27 {strides = array<i32>} : memref<16x32xf32, #tpu.memory_space<vmem>>, vector<16x32xf32>,
      %c0_27 = arith.constant 0 : index
      %c0_28 = arith.constant 0 : index
      %29 = vector.load %arg4[%c0_27, %c0_28] : memref<1x32xf32, #tpu.memory_space<vmem>>, vector<1x32xf32>
      %c0_29 = arith.constant 0 : index
      %c0_30 = arith.constant 0 : index
      %30 = vector.load %arg5[%c0_29, %c0_30] : memref<1x32xf32, #tpu.memory_space<vmem>>, vector<1x32xf32>
      %cst_31 = arith.constant dense<0.000000e+00> : vector<16xf32>
      %31 = vector.multi_reduction <add>, %27, %cst_31 [1] : vector<16x32xf32> to vector<16xf32>
      %32 = vector.shape_cast %31 : vector<16xf32> to vector<16x1xf32>
      %cst_32 = arith.constant 3.200000e+01 : f32
      %33 = vector.broadcast %cst_32 : f32 to vector<16x1xf32>
      %34 = arith.divf %32, %33 : vector<16x1xf32>
      %35 = vector.broadcast %34 : vector<16x1xf32> to vector<16x32xf32>
      %36 = arith.subf %27, %35 : vector<16x32xf32>
      %37 = arith.mulf %36, %36 : vector<16x32xf32>
      %cst_33 = arith.constant dense<0.000000e+00> : vector<16xf32>
      %38 = vector.multi_reduction <add>, %37, %cst_33 [1] : vector<16x32xf32> to vector<16xf32>
      %39 = vector.shape_cast %38 : vector<16xf32> to vector<16x1xf32>
      %cst_34 = arith.constant 0.0322580636 : f32
      %40 = vector.broadcast %cst_34 : f32 to vector<16x1xf32>
      %41 = arith.mulf %39, %40 : vector<16x1xf32>
      %42 = vector.broadcast %29 : vector<1x32xf32> to vector<16x32xf32>
      %43 = arith.mulf %42, %36 : vector<16x32xf32>
      %44 = math.sqrt %41 : vector<16x1xf32>
      %cst_35 = arith.constant 9.99999997E-7 : f32
      %45 = vector.broadcast %cst_35 : f32 to vector<16x1xf32>
      %46 = arith.addf %44, %45 : vector<16x1xf32>
      %47 = vector.broadcast %46 : vector<16x1xf32> to vector<16x32xf32>
      %48 = arith.divf %43, %47 : vector<16x32xf32>
      %49 = vector.broadcast %30 : vector<1x32xf32> to vector<16x32xf32>
      %50 = arith.addf %48, %49 : vector<16x32xf32>
      %51 = arith.truncf %50 : vector<16x32xf32> to vector<16x32xbf16>
      %c0_36 = arith.constant 0 : index
      %c0_37 = arith.constant 0 : index
      %52 = vector.load %arg14[%c0_36, %c0_37] : memref<16x32xbf16, #tpu.memory_space<vmem>>, vector<16x32xbf16>
      tpu.vector_store %arg14[%c0_36, %c0_37], %51 {strides = array<i32>} : memref<16x32xbf16, #tpu.memory_space<vmem>>, vector<16x32xbf16>,
      %cst_38 = arith.constant 0.000000e+00 : f32
      %53 = vector.broadcast %cst_38 : f32 to vector<16x32xf32>
      %c0_39 = arith.constant 0 : index
      %c0_40 = arith.constant 0 : index
      %54 = vector.load %arg15[%c0_39, %c0_40] : memref<16x32xf32, #tpu.memory_space<vmem>>, vector<16x32xf32>
      tpu.vector_store %arg15[%c0_39, %c0_40], %53 {strides = array<i32>} : memref<16x32xf32, #tpu.memory_space<vmem>>, vector<16x32xf32>,
    } else {
    }
    %c0 = arith.constant 0 : index
    %c0_1 = arith.constant 0 : index
    %3 = vector.load %arg14[%c0, %c0_1] : memref<16x32xbf16, #tpu.memory_space<vmem>>, vector<16x32xbf16>
    %c0_2 = arith.constant 0 : index
    %c0_3 = arith.constant 0 : index
    %4 = vector.load %arg8[%c0_2, %c0_3] : memref<32x64xbf16, #tpu.memory_space<vmem>>, vector<32x64xbf16>
    %cst = arith.constant dense<0.000000e+00> : vector<16x64xf32>
    %5 = tpu.matmul %3, %4, %cst {dimension_numbers = #tpu.dot_dimension_numbers<[1], [0], [0], [1], [0, 0, 1, 1], [], []>} : vector<16x32xbf16>, vector<32x64xbf16>, vector<16x64xf32> -> vector<16x64xf32>
    %c0_4 = arith.constant 0 : index
    %c0_5 = arith.constant 0 : index
    %6 = vector.load %arg9[%c0_4, %c0_5] : memref<1x64xf32, #tpu.memory_space<vmem>>, vector<1x64xf32>
    %7 = vector.broadcast %6 : vector<1x64xf32> to vector<16x64xf32>
    %8 = arith.addf %5, %7 : vector<16x64xf32>
    %cst_6 = arith.constant 0.000000e+00 : f32
    %9 = vector.broadcast %cst_6 : f32 to vector<16x64xf32>
    %10 = arith.maximumf %8, %9 : vector<16x64xf32>
    %c0_7 = arith.constant 0 : index
    %c0_8 = arith.constant 0 : index
    %11 = vector.load %arg15[%c0_7, %c0_8] : memref<16x32xf32, #tpu.memory_space<vmem>>, vector<16x32xf32>
    %12 = arith.truncf %10 : vector<16x64xf32> to vector<16x64xbf16>
    %c0_9 = arith.constant 0 : index
    %c0_10 = arith.constant 0 : index
    %13 = vector.load %arg10[%c0_9, %c0_10] : memref<64x32xbf16, #tpu.memory_space<vmem>>, vector<64x32xbf16>
    %cst_11 = arith.constant dense<0.000000e+00> : vector<16x32xf32>
    %14 = tpu.matmul %12, %13, %cst_11 {dimension_numbers = #tpu.dot_dimension_numbers<[1], [0], [0], [1], [0, 0, 1, 1], [], []>} : vector<16x64xbf16>, vector<64x32xbf16>, vector<16x32xf32> -> vector<16x32xf32>
    %15 = arith.addf %11, %14 : vector<16x32xf32>
    %c0_12 = arith.constant 0 : index
    %c0_13 = arith.constant 0 : index
    %16 = vector.load %arg15[%c0_12, %c0_13] : memref<16x32xf32, #tpu.memory_space<vmem>>, vector<16x32xf32>
    tpu.vector_store %arg15[%c0_12, %c0_13], %15 {strides = array<i32>} : memref<16x32xf32, #tpu.memory_space<vmem>>, vector<16x32xf32>,
    %c0_i32_14 = arith.constant 0 : i32
    %17 = arith.cmpi eq, %arg1, %c0_i32_14 : i32
    %18 = arith.extui %17 : i1 to i32
    %c0_i32_15 = arith.constant 0 : i32
    %19 = arith.cmpi ne, %18, %c0_i32_15 : i32
    scf.if %19 {
      %c0_16 = arith.constant 0 : index
      %c0_17 = arith.constant 0 : index
      %20 = vector.load %arg15[%c0_16, %c0_17] : memref<16x32xf32, #tpu.memory_space<vmem>>, vector<16x32xf32>
      %c0_18 = arith.constant 0 : index
      %c0_19 = arith.constant 0 : index
      %21 = vector.load %arg11[%c0_18, %c0_19] : memref<1x32xf32, #tpu.memory_space<vmem>>, vector<1x32xf32>
      %22 = vector.broadcast %21 : vector<1x32xf32> to vector<16x32xf32>
      %23 = arith.addf %20, %22 : vector<16x32xf32>
      %c0_20 = arith.constant 0 : index
      %c0_21 = arith.constant 0 : index
      %24 = vector.load %arg13[%c0_20, %c0_21] : memref<16x32xf32, #tpu.memory_space<vmem>>, vector<16x32xf32>
      %25 = arith.addf %23, %24 : vector<16x32xf32>
      %c0_22 = arith.constant 0 : index
      %c0_23 = arith.constant 0 : index
      %26 = vector.load %arg12[%c0_22, %c0_23] : memref<16x32xf32, #tpu.memory_space<vmem>>, vector<16x32xf32>
      tpu.vector_store %arg12[%c0_22, %c0_23], %25 {strides = array<i32>} : memref<16x32xf32, #tpu.memory_space<vmem>>, vector<16x32xf32>,
    } else {
    }
    return
  }
  func.func @transform_0(%arg0: i32, %arg1: i32) -> (i32, i32) {
    %c0_i32 = arith.constant 0 : i32
    %c0_i32_0 = arith.constant 0 : i32
    return %arg0, %c0_i32 : i32, i32
  }
  func.func @transform_1(%arg0: i32, %arg1: i32) -> (i32, i32) {
    %c0_i32 = arith.constant 0 : i32
    %c0_i32_0 = arith.constant 0 : i32
    return %arg0, %c0_i32 : i32, i32
  }
  func.func @transform_2(%arg0: i32, %arg1: i32) -> (i32, i32) {
    %c0_i32 = arith.constant 0 : i32
    %c0_i32_0 = arith.constant 0 : i32
    %c0_i32_1 = arith.constant 0 : i32
    return %c0_i32, %c0_i32_0 : i32, i32
  }
  func.func @transform_3(%arg0: i32, %arg1: i32) -> (i32, i32) {
    %c0_i32 = arith.constant 0 : i32
    %c0_i32_0 = arith.constant 0 : i32
    %c0_i32_1 = arith.constant 0 : i32
    return %c0_i32, %c0_i32_0 : i32, i32
  }
  func.func @transform_4(%arg0: i32, %arg1: i32) -> (i32, i32) {
    %c0_i32 = arith.constant 0 : i32
    %c0_i32_0 = arith.constant 0 : i32
    %c0_i32_1 = arith.constant 0 : i32
    return %c0_i32, %c0_i32_0 : i32, i32
  }
  func.func @transform_5(%arg0: i32, %arg1: i32) -> (i32, i32) {
    %c0_i32 = arith.constant 0 : i32
    %c0_i32_0 = arith.constant 0 : i32
    %c0_i32_1 = arith.constant 0 : i32
    return %c0_i32, %c0_i32_0 : i32, i32
  }
  func.func @transform_6(%arg0: i32, %arg1: i32) -> (i32, i32) {
    %c0_i32 = arith.constant 0 : i32
    %c0_i32_0 = arith.constant 0 : i32
    return %c0_i32, %arg1 : i32, i32
  }
  func.func @transform_7(%arg0: i32, %arg1: i32) -> (i32, i32) {
    %c0_i32 = arith.constant 0 : i32
    %c0_i32_0 = arith.constant 0 : i32
    return %c0_i32, %arg1 : i32, i32
  }
  func.func @transform_8(%arg0: i32, %arg1: i32) -> (i32, i32) {
    %c0_i32 = arith.constant 0 : i32
    %c0_i32_0 = arith.constant 0 : i32
    return %arg1, %c0_i32 : i32, i32
  }
  func.func @transform_9(%arg0: i32, %arg1: i32) -> (i32, i32) {
    %c0_i32 = arith.constant 0 : i32
    %c0_i32_0 = arith.constant 0 : i32
    %c0_i32_1 = arith.constant 0 : i32
    return %c0_i32, %c0_i32_0 : i32, i32
  }
  func.func @transform_10(%arg0: i32, %arg1: i32) -> (i32, i32) {
    %c0_i32 = arith.constant 0 : i32
    %c0_i32_0 = arith.constant 0 : i32
    return %arg0, %c0_i32 : i32, i32
  }
}

module attributes {stable_mosaic.version = 11 : i64} {
  func.func @ln_qkv_kernel(%arg0: i32, %arg1: memref<16x32xf32, #tpu.memory_space<vmem>>, %arg2: memref<1x32xf32, #tpu.memory_space<vmem>>, %arg3: memref<1x32xf32, #tpu.memory_space<vmem>>, %arg4: memref<32x96xbf16, #tpu.memory_space<vmem>>, %arg5: memref<1x96xf32, #tpu.memory_space<vmem>>, %arg6: memref<16x32xbf16, #tpu.memory_space<vmem>>, %arg7: memref<16x32xbf16, #tpu.memory_space<vmem>>, %arg8: memref<16x32xbf16, #tpu.memory_space<vmem>>) attributes {dimension_semantics = [#tpu.dimension_semantics<parallel>], iteration_bounds = array<i64: 1>, scalar_prefetch = 0 : i64, scratch_operands = 0 : i64, tpu.core_type = #tpu.core_type<tc>, window_params = [{transform_indices = @transform_0, window_bounds = array<i64: 16, 32>}, {pipeline_mode = #tpu.pipeline_mode<synchronous>, transform_indices = @transform_1, window_bounds = array<i64: 1, 32>}, {pipeline_mode = #tpu.pipeline_mode<synchronous>, transform_indices = @transform_2, window_bounds = array<i64: 1, 32>}, {pipeline_mode = #tpu.pipeline_mode<synchronous>, transform_indices = @transform_3, window_bounds = array<i64: 32, 96>}, {pipeline_mode = #tpu.pipeline_mode<synchronous>, transform_indices = @transform_4, window_bounds = array<i64: 1, 96>}, {transform_indices = @transform_5, window_bounds = array<i64: 16, 32>}, {transform_indices = @transform_6, window_bounds = array<i64: 16, 32>}, {transform_indices = @transform_7, window_bounds = array<i64: 16, 32>}]} {
    %c0 = arith.constant 0 : index
    %c0_0 = arith.constant 0 : index
    %0 = vector.load %arg1[%c0, %c0_0] : memref<16x32xf32, #tpu.memory_space<vmem>>, vector<16x32xf32>
    %c0_1 = arith.constant 0 : index
    %c0_2 = arith.constant 0 : index
    %1 = vector.load %arg2[%c0_1, %c0_2] : memref<1x32xf32, #tpu.memory_space<vmem>>, vector<1x32xf32>
    %c0_3 = arith.constant 0 : index
    %c0_4 = arith.constant 0 : index
    %2 = vector.load %arg3[%c0_3, %c0_4] : memref<1x32xf32, #tpu.memory_space<vmem>>, vector<1x32xf32>
    %cst = arith.constant dense<0.000000e+00> : vector<16xf32>
    %3 = vector.multi_reduction <add>, %0, %cst [1] : vector<16x32xf32> to vector<16xf32>
    %4 = vector.shape_cast %3 : vector<16xf32> to vector<16x1xf32>
    %cst_5 = arith.constant 3.200000e+01 : f32
    %5 = vector.broadcast %cst_5 : f32 to vector<16x1xf32>
    %6 = arith.divf %4, %5 : vector<16x1xf32>
    %7 = vector.broadcast %6 : vector<16x1xf32> to vector<16x32xf32>
    %8 = arith.subf %0, %7 : vector<16x32xf32>
    %9 = arith.mulf %8, %8 : vector<16x32xf32>
    %cst_6 = arith.constant dense<0.000000e+00> : vector<16xf32>
    %10 = vector.multi_reduction <add>, %9, %cst_6 [1] : vector<16x32xf32> to vector<16xf32>
    %11 = vector.shape_cast %10 : vector<16xf32> to vector<16x1xf32>
    %cst_7 = arith.constant 0.0322580636 : f32
    %12 = vector.broadcast %cst_7 : f32 to vector<16x1xf32>
    %13 = arith.mulf %11, %12 : vector<16x1xf32>
    %14 = vector.broadcast %1 : vector<1x32xf32> to vector<16x32xf32>
    %15 = arith.mulf %14, %8 : vector<16x32xf32>
    %16 = math.sqrt %13 : vector<16x1xf32>
    %cst_8 = arith.constant 9.99999997E-7 : f32
    %17 = vector.broadcast %cst_8 : f32 to vector<16x1xf32>
    %18 = arith.addf %16, %17 : vector<16x1xf32>
    %19 = vector.broadcast %18 : vector<16x1xf32> to vector<16x32xf32>
    %20 = arith.divf %15, %19 : vector<16x32xf32>
    %21 = vector.broadcast %2 : vector<1x32xf32> to vector<16x32xf32>
    %22 = arith.addf %20, %21 : vector<16x32xf32>
    %23 = arith.truncf %22 : vector<16x32xf32> to vector<16x32xbf16>
    %c0_9 = arith.constant 0 : index
    %c0_10 = arith.constant 0 : index
    %24 = vector.load %arg4[%c0_9, %c0_10] : memref<32x96xbf16, #tpu.memory_space<vmem>>, vector<32x96xbf16>
    %cst_11 = arith.constant dense<0.000000e+00> : vector<16x96xf32>
    %25 = tpu.matmul %23, %24, %cst_11 {dimension_numbers = #tpu.dot_dimension_numbers<[1], [0], [0], [1], [0, 0, 1, 1], [], []>} : vector<16x32xbf16>, vector<32x96xbf16>, vector<16x96xf32> -> vector<16x96xf32>
    %c0_12 = arith.constant 0 : index
    %c0_13 = arith.constant 0 : index
    %26 = vector.load %arg5[%c0_12, %c0_13] : memref<1x96xf32, #tpu.memory_space<vmem>>, vector<1x96xf32>
    %27 = vector.broadcast %26 : vector<1x96xf32> to vector<16x96xf32>
    %28 = arith.addf %25, %27 : vector<16x96xf32>
    %29 = vector.extract_strided_slice %28 {offsets = [0, 0], sizes = [16, 32], strides = [1, 1]} : vector<16x96xf32> to vector<16x32xf32>
    %30 = arith.truncf %29 : vector<16x32xf32> to vector<16x32xbf16>
    %c0_14 = arith.constant 0 : index
    %c0_15 = arith.constant 0 : index
    %31 = vector.load %arg6[%c0_14, %c0_15] : memref<16x32xbf16, #tpu.memory_space<vmem>>, vector<16x32xbf16>
    tpu.vector_store %arg6[%c0_14, %c0_15], %30 {strides = array<i32>} : memref<16x32xbf16, #tpu.memory_space<vmem>>, vector<16x32xbf16>,
    %32 = vector.extract_strided_slice %28 {offsets = [0, 32], sizes = [16, 32], strides = [1, 1]} : vector<16x96xf32> to vector<16x32xf32>
    %33 = arith.truncf %32 : vector<16x32xf32> to vector<16x32xbf16>
    %c0_16 = arith.constant 0 : index
    %c0_17 = arith.constant 0 : index
    %34 = vector.load %arg7[%c0_16, %c0_17] : memref<16x32xbf16, #tpu.memory_space<vmem>>, vector<16x32xbf16>
    tpu.vector_store %arg7[%c0_16, %c0_17], %33 {strides = array<i32>} : memref<16x32xbf16, #tpu.memory_space<vmem>>, vector<16x32xbf16>,
    %35 = vector.extract_strided_slice %28 {offsets = [0, 64], sizes = [16, 32], strides = [1, 1]} : vector<16x96xf32> to vector<16x32xf32>
    %36 = arith.truncf %35 : vector<16x32xf32> to vector<16x32xbf16>
    %c0_18 = arith.constant 0 : index
    %c0_19 = arith.constant 0 : index
    %37 = vector.load %arg8[%c0_18, %c0_19] : memref<16x32xbf16, #tpu.memory_space<vmem>>, vector<16x32xbf16>
    tpu.vector_store %arg8[%c0_18, %c0_19], %36 {strides = array<i32>} : memref<16x32xbf16, #tpu.memory_space<vmem>>, vector<16x32xbf16>,
    return
  }
  func.func @transform_0(%arg0: i32) -> (i32, i32) {
    %c0_i32 = arith.constant 0 : i32
    %c0_i32_0 = arith.constant 0 : i32
    return %arg0, %c0_i32 : i32, i32
  }
  func.func @transform_1(%arg0: i32) -> (i32, i32) {
    %c0_i32 = arith.constant 0 : i32
    %c0_i32_0 = arith.constant 0 : i32
    %c0_i32_1 = arith.constant 0 : i32
    return %c0_i32, %c0_i32_0 : i32, i32
  }
  func.func @transform_2(%arg0: i32) -> (i32, i32) {
    %c0_i32 = arith.constant 0 : i32
    %c0_i32_0 = arith.constant 0 : i32
    %c0_i32_1 = arith.constant 0 : i32
    return %c0_i32, %c0_i32_0 : i32, i32
  }
  func.func @transform_3(%arg0: i32) -> (i32, i32) {
    %c0_i32 = arith.constant 0 : i32
    %c0_i32_0 = arith.constant 0 : i32
    %c0_i32_1 = arith.constant 0 : i32
    return %c0_i32, %c0_i32_0 : i32, i32
  }
  func.func @transform_4(%arg0: i32) -> (i32, i32) {
    %c0_i32 = arith.constant 0 : i32
    %c0_i32_0 = arith.constant 0 : i32
    %c0_i32_1 = arith.constant 0 : i32
    return %c0_i32, %c0_i32_0 : i32, i32
  }
  func.func @transform_5(%arg0: i32) -> (i32, i32) {
    %c0_i32 = arith.constant 0 : i32
    %c0_i32_0 = arith.constant 0 : i32
    return %arg0, %c0_i32 : i32, i32
  }
  func.func @transform_6(%arg0: i32) -> (i32, i32) {
    %c0_i32 = arith.constant 0 : i32
    %c0_i32_0 = arith.constant 0 : i32
    return %arg0, %c0_i32 : i32, i32
  }
  func.func @transform_7(%arg0: i32) -> (i32, i32) {
    %c0_i32 = arith.constant 0 : i32
    %c0_i32_0 = arith.constant 0 : i32
    return %arg0, %c0_i32 : i32, i32
  }
}

module attributes {stable_mosaic.version = 11 : i64} {
  func.func @flash_attn_kernel(%arg0: i32, %arg1: i32, %arg2: i32, %arg3: memref<1x1x8xf32, #tpu.memory_space<vmem>>, %arg4: memref<1x8x32xbf16, #tpu.memory_space<vmem>>, %arg5: memref<1x8x32xbf16, #tpu.memory_space<vmem>>, %arg6: memref<1x8x32xbf16, #tpu.memory_space<vmem>>, %arg7: memref<1x8x32xbf16, #tpu.memory_space<vmem>>, %arg8: memref<4x8x1xf32, #tpu.memory_space<vmem>>, %arg9: memref<4x8x1xf32, #tpu.memory_space<vmem>>, %arg10: memref<8x32xf32, #tpu.memory_space<vmem>>) attributes {dimension_semantics = [#tpu.dimension_semantics<parallel>, #tpu.dimension_semantics<parallel>, #tpu.dimension_semantics<arbitrary>], iteration_bounds = array<i64: 2, 1, 1>, scalar_prefetch = 0 : i64, scratch_operands = 3 : i64, tpu.core_type = #tpu.core_type<tc>, window_params = [{transform_indices = @transform_0, window_bounds = array<i64: 1, 1, 8>}, {transform_indices = @transform_1, window_bounds = array<i64: 1, 8, 32>}, {transform_indices = @transform_2, window_bounds = array<i64: 1, 8, 32>}, {transform_indices = @transform_3, window_bounds = array<i64: 1, 8, 32>}, {transform_indices = @transform_4, window_bounds = array<i64: 1, 8, 32>}]} {
    %c0_i32 = arith.constant 0 : i32
    %0 = arith.cmpi eq, %arg2, %c0_i32 : i32
    %1 = arith.extui %0 : i1 to i32
    %c0_i32_0 = arith.constant 0 : i32
    %2 = arith.cmpi ne, %1, %c0_i32_0 : i32
    scf.if %2 {
      %cst_117 = arith.constant 0xFF800000 : f32
      %165 = vector.broadcast %cst_117 : f32 to vector<4x8x1xf32>
      %c0_118 = arith.constant 0 : index
      %c0_119 = arith.constant 0 : index
      %c0_120 = arith.constant 0 : index
      %166 = vector.load %arg8[%c0_118, %c0_119, %c0_120] : memref<4x8x1xf32, #tpu.memory_space<vmem>>, vector<4x8x1xf32>
      tpu.vector_store %arg8[%c0_118, %c0_119, %c0_120], %165 {strides = array<i32>} : memref<4x8x1xf32, #tpu.memory_space<vmem>>, vector<4x8x1xf32>,
      %cst_121 = arith.constant 0.000000e+00 : f32
      %167 = vector.broadcast %cst_121 : f32 to vector<4x8x1xf32>
      %c0_122 = arith.constant 0 : index
      %c0_123 = arith.constant 0 : index
      %c0_124 = arith.constant 0 : index
      %168 = vector.load %arg9[%c0_122, %c0_123, %c0_124] : memref<4x8x1xf32, #tpu.memory_space<vmem>>, vector<4x8x1xf32>
      tpu.vector_store %arg9[%c0_122, %c0_123, %c0_124], %167 {strides = array<i32>} : memref<4x8x1xf32, #tpu.memory_space<vmem>>, vector<4x8x1xf32>,
      %cst_125 = arith.constant 0.000000e+00 : f32
      %169 = vector.broadcast %cst_125 : f32 to vector<8x32xf32>
      %c0_126 = arith.constant 0 : index
      %c0_127 = arith.constant 0 : index
      %170 = vector.load %arg10[%c0_126, %c0_127] : memref<8x32xf32, #tpu.memory_space<vmem>>, vector<8x32xf32>
      tpu.vector_store %arg10[%c0_126, %c0_127], %169 {strides = array<i32>} : memref<8x32xf32, #tpu.memory_space<vmem>>, vector<8x32xf32>,
    } else {
    }
    %c0 = arith.constant 0 : index
    %c0_1 = arith.constant 0 : index
    %c0_2 = arith.constant 0 : index
    %3 = vector.load %arg3[%c0, %c0_1, %c0_2] : memref<1x1x8xf32, #tpu.memory_space<vmem>>, vector<1x1x8xf32>
    %4 = vector.shape_cast %3 : vector<1x1x8xf32> to vector<1x8xf32>
    %cst = arith.constant 0.000000e+00 : f32
    %5 = vector.broadcast %cst : f32 to vector<1x8xf32>
    %6 = arith.cmpf oeq, %4, %5 : vector<1x8xf32>
    %cst_3 = arith.constant -1.000000e+09 : f32
    %cst_4 = arith.constant 0.000000e+00 : f32
    %7 = vector.broadcast %cst_3 : f32 to vector<1x8xf32>
    %8 = vector.broadcast %cst_4 : f32 to vector<1x8xf32>
    %9 = arith.select %6, %7, %8 : vector<1x8xi1>, vector<1x8xf32>
    %c0_5 = arith.constant 0 : index
    %c0_6 = arith.constant 0 : index
    %c0_7 = arith.constant 0 : index
    %10 = vector.load %arg4[%c0_5, %c0_6, %c0_7] : memref<1x8x32xbf16, #tpu.memory_space<vmem>>, vector<1x8x8xbf16>
    %11 = vector.shape_cast %10 : vector<1x8x8xbf16> to vector<8x8xbf16>
    %c0_8 = arith.constant 0 : index
    %c0_9 = arith.constant 0 : index
    %c0_10 = arith.constant 0 : index
    %12 = vector.load %arg5[%c0_8, %c0_9, %c0_10] : memref<1x8x32xbf16, #tpu.memory_space<vmem>>, vector<1x8x8xbf16>
    %13 = vector.shape_cast %12 : vector<1x8x8xbf16> to vector<8x8xbf16>
    %c0_11 = arith.constant 0 : index
    %c0_12 = arith.constant 0 : index
    %c0_13 = arith.constant 0 : index
    %14 = vector.load %arg6[%c0_11, %c0_12, %c0_13] : memref<1x8x32xbf16, #tpu.memory_space<vmem>>, vector<1x8x8xbf16>
    %15 = vector.shape_cast %14 : vector<1x8x8xbf16> to vector<8x8xbf16>
    %cst_14 = arith.constant dense<0.000000e+00> : vector<8x8xf32>
    %16 = tpu.matmul %11, %13, %cst_14 {dimension_numbers = #tpu.dot_dimension_numbers<[1], [1], [0], [0], [0, 0, 1, 0], [], []>} : vector<8x8xbf16>, vector<8x8xbf16>, vector<8x8xf32> -> vector<8x8xf32>
    %17 = vector.broadcast %9 : vector<1x8xf32> to vector<8x8xf32>
    %18 = arith.addf %16, %17 : vector<8x8xf32>
    %c0_15 = arith.constant 0 : index
    %c0_16 = arith.constant 0 : index
    %c0_17 = arith.constant 0 : index
    %19 = vector.load %arg8[%c0_15, %c0_16, %c0_17] : memref<4x8x1xf32, #tpu.memory_space<vmem>>, vector<1x8x1xf32>
    %20 = vector.shape_cast %19 : vector<1x8x1xf32> to vector<8x1xf32>
    %cst_18 = arith.constant dense<0xFF800000> : vector<8xf32>
    %21 = vector.multi_reduction <maximumf>, %18, %cst_18 [1] : vector<8x8xf32> to vector<8xf32>
    %22 = vector.shape_cast %21 : vector<8xf32> to vector<8x1xf32>
    %23 = arith.maximumf %20, %22 : vector<8x1xf32>
    %24 = arith.subf %20, %23 : vector<8x1xf32>
    %25 = math.exp %24 : vector<8x1xf32>
    %26 = vector.broadcast %23 : vector<8x1xf32> to vector<8x8xf32>
    %27 = arith.subf %18, %26 : vector<8x8xf32>
    %28 = math.exp %27 : vector<8x8xf32>
    %c0_19 = arith.constant 0 : index
    %c0_20 = arith.constant 0 : index
    %c0_21 = arith.constant 0 : index
    %29 = vector.load %arg9[%c0_19, %c0_20, %c0_21] : memref<4x8x1xf32, #tpu.memory_space<vmem>>, vector<1x8x1xf32>
    %30 = vector.shape_cast %29 : vector<1x8x1xf32> to vector<8x1xf32>
    %31 = arith.mulf %25, %30 : vector<8x1xf32>
    %cst_22 = arith.constant dense<0.000000e+00> : vector<8xf32>
    %32 = vector.multi_reduction <add>, %28, %cst_22 [1] : vector<8x8xf32> to vector<8xf32>
    %33 = vector.shape_cast %32 : vector<8xf32> to vector<8x1xf32>
    %34 = arith.addf %31, %33 : vector<8x1xf32>
    %c0_23 = arith.constant 0 : index
    %c0_24 = arith.constant 0 : index
    %c0_25 = arith.constant 0 : index
    %35 = vector.load %arg9[%c0_23, %c0_24, %c0_25] : memref<4x8x1xf32, #tpu.memory_space<vmem>>, vector<1x8x1xf32>
    %36 = vector.shape_cast %35 : vector<1x8x1xf32> to vector<8x1xf32>
    %37 = vector.shape_cast %34 : vector<8x1xf32> to vector<1x8x1xf32>
    tpu.vector_store %arg9[%c0_23, %c0_24, %c0_25], %37 {strides = array<i32>} : memref<4x8x1xf32, #tpu.memory_space<vmem>>, vector<1x8x1xf32>,
    %38 = arith.truncf %28 : vector<8x8xf32> to vector<8x8xbf16>
    %cst_26 = arith.constant dense<0.000000e+00> : vector<8x8xf32>
    %39 = tpu.matmul %38, %15, %cst_26 {dimension_numbers = #tpu.dot_dimension_numbers<[1], [0], [0], [1], [0, 0, 1, 1], [], []>} : vector<8x8xbf16>, vector<8x8xbf16>, vector<8x8xf32> -> vector<8x8xf32>
    %c0_27 = arith.constant 0 : index
    %c0_28 = arith.constant 0 : index
    %40 = vector.load %arg10[%c0_27, %c0_28] : memref<8x32xf32, #tpu.memory_space<vmem>>, vector<8x8xf32>
    %41 = vector.broadcast %25 : vector<8x1xf32> to vector<8x8xf32>
    %42 = arith.mulf %41, %40 : vector<8x8xf32>
    %43 = arith.addf %42, %39 : vector<8x8xf32>
    %c0_29 = arith.constant 0 : index
    %c0_30 = arith.constant 0 : index
    %44 = vector.load %arg10[%c0_29, %c0_30] : memref<8x32xf32, #tpu.memory_space<vmem>>, vector<8x8xf32>
    tpu.vector_store %arg10[%c0_29, %c0_30], %43 {strides = array<i32>} : memref<8x32xf32, #tpu.memory_space<vmem>>, vector<8x8xf32>,
    %c0_31 = arith.constant 0 : index
    %c0_32 = arith.constant 0 : index
    %c0_33 = arith.constant 0 : index
    %45 = vector.load %arg8[%c0_31, %c0_32, %c0_33] : memref<4x8x1xf32, #tpu.memory_space<vmem>>, vector<1x8x1xf32>
    %46 = vector.shape_cast %45 : vector<1x8x1xf32> to vector<8x1xf32>
    %47 = vector.shape_cast %23 : vector<8x1xf32> to vector<1x8x1xf32>
    tpu.vector_store %arg8[%c0_31, %c0_32, %c0_33], %47 {strides = array<i32>} : memref<4x8x1xf32, #tpu.memory_space<vmem>>, vector<1x8x1xf32>,
    %c0_34 = arith.constant 0 : index
    %c0_35 = arith.constant 0 : index
    %c8 = arith.constant 8 : index
    %48 = vector.load %arg4[%c0_34, %c0_35, %c8] : memref<1x8x32xbf16, #tpu.memory_space<vmem>>, vector<1x8x8xbf16>
    %49 = vector.shape_cast %48 : vector<1x8x8xbf16> to vector<8x8xbf16>
    %c0_36 = arith.constant 0 : index
    %c0_37 = arith.constant 0 : index
    %c8_38 = arith.constant 8 : index
    %50 = vector.load %arg5[%c0_36, %c0_37, %c8_38] : memref<1x8x32xbf16, #tpu.memory_space<vmem>>, vector<1x8x8xbf16>
    %51 = vector.shape_cast %50 : vector<1x8x8xbf16> to vector<8x8xbf16>
    %c0_39 = arith.constant 0 : index
    %c0_40 = arith.constant 0 : index
    %c8_41 = arith.constant 8 : index
    %52 = vector.load %arg6[%c0_39, %c0_40, %c8_41] : memref<1x8x32xbf16, #tpu.memory_space<vmem>>, vector<1x8x8xbf16>
    %53 = vector.shape_cast %52 : vector<1x8x8xbf16> to vector<8x8xbf16>
    %cst_42 = arith.constant dense<0.000000e+00> : vector<8x8xf32>
    %54 = tpu.matmul %49, %51, %cst_42 {dimension_numbers = #tpu.dot_dimension_numbers<[1], [1], [0], [0], [0, 0, 1, 0], [], []>} : vector<8x8xbf16>, vector<8x8xbf16>, vector<8x8xf32> -> vector<8x8xf32>
    %55 = vector.broadcast %9 : vector<1x8xf32> to vector<8x8xf32>
    %56 = arith.addf %54, %55 : vector<8x8xf32>
    %c1 = arith.constant 1 : index
    %c0_43 = arith.constant 0 : index
    %c0_44 = arith.constant 0 : index
    %57 = vector.load %arg8[%c1, %c0_43, %c0_44] : memref<4x8x1xf32, #tpu.memory_space<vmem>>, vector<1x8x1xf32>
    %58 = vector.shape_cast %57 : vector<1x8x1xf32> to vector<8x1xf32>
    %cst_45 = arith.constant dense<0xFF800000> : vector<8xf32>
    %59 = vector.multi_reduction <maximumf>, %56, %cst_45 [1] : vector<8x8xf32> to vector<8xf32>
    %60 = vector.shape_cast %59 : vector<8xf32> to vector<8x1xf32>
    %61 = arith.maximumf %58, %60 : vector<8x1xf32>
    %62 = arith.subf %58, %61 : vector<8x1xf32>
    %63 = math.exp %62 : vector<8x1xf32>
    %64 = vector.broadcast %61 : vector<8x1xf32> to vector<8x8xf32>
    %65 = arith.subf %56, %64 : vector<8x8xf32>
    %66 = math.exp %65 : vector<8x8xf32>
    %c1_46 = arith.constant 1 : index
    %c0_47 = arith.constant 0 : index
    %c0_48 = arith.constant 0 : index
    %67 = vector.load %arg9[%c1_46, %c0_47, %c0_48] : memref<4x8x1xf32, #tpu.memory_space<vmem>>, vector<1x8x1xf32>
    %68 = vector.shape_cast %67 : vector<1x8x1xf32> to vector<8x1xf32>
    %69 = arith.mulf %63, %68 : vector<8x1xf32>
    %cst_49 = arith.constant dense<0.000000e+00> : vector<8xf32>
    %70 = vector.multi_reduction <add>, %66, %cst_49 [1] : vector<8x8xf32> to vector<8xf32>
    %71 = vector.shape_cast %70 : vector<8xf32> to vector<8x1xf32>
    %72 = arith.addf %69, %71 : vector<8x1xf32>
    %c1_50 = arith.constant 1 : index
    %c0_51 = arith.constant 0 : index
    %c0_52 = arith.constant 0 : index
    %73 = vector.load %arg9[%c1_50, %c0_51, %c0_52] : memref<4x8x1xf32, #tpu.memory_space<vmem>>, vector<1x8x1xf32>
    %74 = vector.shape_cast %73 : vector<1x8x1xf32> to vector<8x1xf32>
    %75 = vector.shape_cast %72 : vector<8x1xf32> to vector<1x8x1xf32>
    tpu.vector_store %arg9[%c1_50, %c0_51, %c0_52], %75 {strides = array<i32>} : memref<4x8x1xf32, #tpu.memory_space<vmem>>, vector<1x8x1xf32>,
    %76 = arith.truncf %66 : vector<8x8xf32> to vector<8x8xbf16>
    %cst_53 = arith.constant dense<0.000000e+00> : vector<8x8xf32>
    %77 = tpu.matmul %76, %53, %cst_53 {dimension_numbers = #tpu.dot_dimension_numbers<[1], [0], [0], [1], [0, 0, 1, 1], [], []>} : vector<8x8xbf16>, vector<8x8xbf16>, vector<8x8xf32> -> vector<8x8xf32>
    %c0_54 = arith.constant 0 : index
    %c8_55 = arith.constant 8 : index
    %78 = vector.load %arg10[%c0_54, %c8_55] : memref<8x32xf32, #tpu.memory_space<vmem>>, vector<8x8xf32>
    %79 = vector.broadcast %63 : vector<8x1xf32> to vector<8x8xf32>
    %80 = arith.mulf %79, %78 : vector<8x8xf32>
    %81 = arith.addf %80, %77 : vector<8x8xf32>
    %c0_56 = arith.constant 0 : index
    %c8_57 = arith.constant 8 : index
    %82 = vector.load %arg10[%c0_56, %c8_57] : memref<8x32xf32, #tpu.memory_space<vmem>>, vector<8x8xf32>
    tpu.vector_store %arg10[%c0_56, %c8_57], %81 {strides = array<i32>} : memref<8x32xf32, #tpu.memory_space<vmem>>, vector<8x8xf32>,
    %c1_58 = arith.constant 1 : index
    %c0_59 = arith.constant 0 : index
    %c0_60 = arith.constant 0 : index
    %83 = vector.load %arg8[%c1_58, %c0_59, %c0_60] : memref<4x8x1xf32, #tpu.memory_space<vmem>>, vector<1x8x1xf32>
    %84 = vector.shape_cast %83 : vector<1x8x1xf32> to vector<8x1xf32>
    %85 = vector.shape_cast %61 : vector<8x1xf32> to vector<1x8x1xf32>
    tpu.vector_store %arg8[%c1_58, %c0_59, %c0_60], %85 {strides = array<i32>} : memref<4x8x1xf32, #tpu.memory_space<vmem>>, vector<1x8x1xf32>,
    %c0_61 = arith.constant 0 : index
    %c0_62 = arith.constant 0 : index
    %c16 = arith.constant 16 : index
    %86 = vector.load %arg4[%c0_61, %c0_62, %c16] : memref<1x8x32xbf16, #tpu.memory_space<vmem>>, vector<1x8x8xbf16>
    %87 = vector.shape_cast %86 : vector<1x8x8xbf16> to vector<8x8xbf16>
    %c0_63 = arith.constant 0 : index
    %c0_64 = arith.constant 0 : index
    %c16_65 = arith.constant 16 : index
    %88 = vector.load %arg5[%c0_63, %c0_64, %c16_65] : memref<1x8x32xbf16, #tpu.memory_space<vmem>>, vector<1x8x8xbf16>
    %89 = vector.shape_cast %88 : vector<1x8x8xbf16> to vector<8x8xbf16>
    %c0_66 = arith.constant 0 : index
    %c0_67 = arith.constant 0 : index
    %c16_68 = arith.constant 16 : index
    %90 = vector.load %arg6[%c0_66, %c0_67, %c16_68] : memref<1x8x32xbf16, #tpu.memory_space<vmem>>, vector<1x8x8xbf16>
    %91 = vector.shape_cast %90 : vector<1x8x8xbf16> to vector<8x8xbf16>
    %cst_69 = arith.constant dense<0.000000e+00> : vector<8x8xf32>
    %92 = tpu.matmul %87, %89, %cst_69 {dimension_numbers = #tpu.dot_dimension_numbers<[1], [1], [0], [0], [0, 0, 1, 0], [], []>} : vector<8x8xbf16>, vector<8x8xbf16>, vector<8x8xf32> -> vector<8x8xf32>
    %93 = vector.broadcast %9 : vector<1x8xf32> to vector<8x8xf32>
    %94 = arith.addf %92, %93 : vector<8x8xf32>
    %c2 = arith.constant 2 : index
    %c0_70 = arith.constant 0 : index
    %c0_71 = arith.constant 0 : index
    %95 = vector.load %arg8[%c2, %c0_70, %c0_71] : memref<4x8x1xf32, #tpu.memory_space<vmem>>, vector<1x8x1xf32>
    %96 = vector.shape_cast %95 : vector<1x8x1xf32> to vector<8x1xf32>
    %cst_72 = arith.constant dense<0xFF800000> : vector<8xf32>
    %97 = vector.multi_reduction <maximumf>, %94, %cst_72 [1] : vector<8x8xf32> to vector<8xf32>
    %98 = vector.shape_cast %97 : vector<8xf32> to vector<8x1xf32>
    %99 = arith.maximumf %96, %98 : vector<8x1xf32>
    %100 = arith.subf %96, %99 : vector<8x1xf32>
    %101 = math.exp %100 : vector<8x1xf32>
    %102 = vector.broadcast %99 : vector<8x1xf32> to vector<8x8xf32>
    %103 = arith.subf %94, %102 : vector<8x8xf32>
    %104 = math.exp %103 : vector<8x8xf32>
    %c2_73 = arith.constant 2 : index
    %c0_74 = arith.constant 0 : index
    %c0_75 = arith.constant 0 : index
    %105 = vector.load %arg9[%c2_73, %c0_74, %c0_75] : memref<4x8x1xf32, #tpu.memory_space<vmem>>, vector<1x8x1xf32>
    %106 = vector.shape_cast %105 : vector<1x8x1xf32> to vector<8x1xf32>
    %107 = arith.mulf %101, %106 : vector<8x1xf32>
    %cst_76 = arith.constant dense<0.000000e+00> : vector<8xf32>
    %108 = vector.multi_reduction <add>, %104, %cst_76 [1] : vector<8x8xf32> to vector<8xf32>
    %109 = vector.shape_cast %108 : vector<8xf32> to vector<8x1xf32>
    %110 = arith.addf %107, %109 : vector<8x1xf32>
    %c2_77 = arith.constant 2 : index
    %c0_78 = arith.constant 0 : index
    %c0_79 = arith.constant 0 : index
    %111 = vector.load %arg9[%c2_77, %c0_78, %c0_79] : memref<4x8x1xf32, #tpu.memory_space<vmem>>, vector<1x8x1xf32>
    %112 = vector.shape_cast %111 : vector<1x8x1xf32> to vector<8x1xf32>
    %113 = vector.shape_cast %110 : vector<8x1xf32> to vector<1x8x1xf32>
    tpu.vector_store %arg9[%c2_77, %c0_78, %c0_79], %113 {strides = array<i32>} : memref<4x8x1xf32, #tpu.memory_space<vmem>>, vector<1x8x1xf32>,
    %114 = arith.truncf %104 : vector<8x8xf32> to vector<8x8xbf16>
    %cst_80 = arith.constant dense<0.000000e+00> : vector<8x8xf32>
    %115 = tpu.matmul %114, %91, %cst_80 {dimension_numbers = #tpu.dot_dimension_numbers<[1], [0], [0], [1], [0, 0, 1, 1], [], []>} : vector<8x8xbf16>, vector<8x8xbf16>, vector<8x8xf32> -> vector<8x8xf32>
    %c0_81 = arith.constant 0 : index
    %c16_82 = arith.constant 16 : index
    %116 = vector.load %arg10[%c0_81, %c16_82] : memref<8x32xf32, #tpu.memory_space<vmem>>, vector<8x8xf32>
    %117 = vector.broadcast %101 : vector<8x1xf32> to vector<8x8xf32>
    %118 = arith.mulf %117, %116 : vector<8x8xf32>
    %119 = arith.addf %118, %115 : vector<8x8xf32>
    %c0_83 = arith.constant 0 : index
    %c16_84 = arith.constant 16 : index
    %120 = vector.load %arg10[%c0_83, %c16_84] : memref<8x32xf32, #tpu.memory_space<vmem>>, vector<8x8xf32>
    tpu.vector_store %arg10[%c0_83, %c16_84], %119 {strides = array<i32>} : memref<8x32xf32, #tpu.memory_space<vmem>>, vector<8x8xf32>,
    %c2_85 = arith.constant 2 : index
    %c0_86 = arith.constant 0 : index
    %c0_87 = arith.constant 0 : index
    %121 = vector.load %arg8[%c2_85, %c0_86, %c0_87] : memref<4x8x1xf32, #tpu.memory_space<vmem>>, vector<1x8x1xf32>
    %122 = vector.shape_cast %121 : vector<1x8x1xf32> to vector<8x1xf32>
    %123 = vector.shape_cast %99 : vector<8x1xf32> to vector<1x8x1xf32>
    tpu.vector_store %arg8[%c2_85, %c0_86, %c0_87], %123 {strides = array<i32>} : memref<4x8x1xf32, #tpu.memory_space<vmem>>, vector<1x8x1xf32>,
    %c0_88 = arith.constant 0 : index
    %c0_89 = arith.constant 0 : index
    %c24 = arith.constant 24 : index
    %124 = vector.load %arg4[%c0_88, %c0_89, %c24] : memref<1x8x32xbf16, #tpu.memory_space<vmem>>, vector<1x8x8xbf16>
    %125 = vector.shape_cast %124 : vector<1x8x8xbf16> to vector<8x8xbf16>
    %c0_90 = arith.constant 0 : index
    %c0_91 = arith.constant 0 : index
    %c24_92 = arith.constant 24 : index
    %126 = vector.load %arg5[%c0_90, %c0_91, %c24_92] : memref<1x8x32xbf16, #tpu.memory_space<vmem>>, vector<1x8x8xbf16>
    %127 = vector.shape_cast %126 : vector<1x8x8xbf16> to vector<8x8xbf16>
    %c0_93 = arith.constant 0 : index
    %c0_94 = arith.constant 0 : index
    %c24_95 = arith.constant 24 : index
    %128 = vector.load %arg6[%c0_93, %c0_94, %c24_95] : memref<1x8x32xbf16, #tpu.memory_space<vmem>>, vector<1x8x8xbf16>
    %129 = vector.shape_cast %128 : vector<1x8x8xbf16> to vector<8x8xbf16>
    %cst_96 = arith.constant dense<0.000000e+00> : vector<8x8xf32>
    %130 = tpu.matmul %125, %127, %cst_96 {dimension_numbers = #tpu.dot_dimension_numbers<[1], [1], [0], [0], [0, 0, 1, 0], [], []>} : vector<8x8xbf16>, vector<8x8xbf16>, vector<8x8xf32> -> vector<8x8xf32>
    %131 = vector.broadcast %9 : vector<1x8xf32> to vector<8x8xf32>
    %132 = arith.addf %130, %131 : vector<8x8xf32>
    %c3 = arith.constant 3 : index
    %c0_97 = arith.constant 0 : index
    %c0_98 = arith.constant 0 : index
    %133 = vector.load %arg8[%c3, %c0_97, %c0_98] : memref<4x8x1xf32, #tpu.memory_space<vmem>>, vector<1x8x1xf32>
    %134 = vector.shape_cast %133 : vector<1x8x1xf32> to vector<8x1xf32>
    %cst_99 = arith.constant dense<0xFF800000> : vector<8xf32>
    %135 = vector.multi_reduction <maximumf>, %132, %cst_99 [1] : vector<8x8xf32> to vector<8xf32>
    %136 = vector.shape_cast %135 : vector<8xf32> to vector<8x1xf32>
    %137 = arith.maximumf %134, %136 : vector<8x1xf32>
    %138 = arith.subf %134, %137 : vector<8x1xf32>
    %139 = math.exp %138 : vector<8x1xf32>
    %140 = vector.broadcast %137 : vector<8x1xf32> to vector<8x8xf32>
    %141 = arith.subf %132, %140 : vector<8x8xf32>
    %142 = math.exp %141 : vector<8x8xf32>
    %c3_100 = arith.constant 3 : index
    %c0_101 = arith.constant 0 : index
    %c0_102 = arith.constant 0 : index
    %143 = vector.load %arg9[%c3_100, %c0_101, %c0_102] : memref<4x8x1xf32, #tpu.memory_space<vmem>>, vector<1x8x1xf32>
    %144 = vector.shape_cast %143 : vector<1x8x1xf32> to vector<8x1xf32>
    %145 = arith.mulf %139, %144 : vector<8x1xf32>
    %cst_103 = arith.constant dense<0.000000e+00> : vector<8xf32>
    %146 = vector.multi_reduction <add>, %142, %cst_103 [1] : vector<8x8xf32> to vector<8xf32>
    %147 = vector.shape_cast %146 : vector<8xf32> to vector<8x1xf32>
    %148 = arith.addf %145, %147 : vector<8x1xf32>
    %c3_104 = arith.constant 3 : index
    %c0_105 = arith.constant 0 : index
    %c0_106 = arith.constant 0 : index
    %149 = vector.load %arg9[%c3_104, %c0_105, %c0_106] : memref<4x8x1xf32, #tpu.memory_space<vmem>>, vector<1x8x1xf32>
    %150 = vector.shape_cast %149 : vector<1x8x1xf32> to vector<8x1xf32>
    %151 = vector.shape_cast %148 : vector<8x1xf32> to vector<1x8x1xf32>
    tpu.vector_store %arg9[%c3_104, %c0_105, %c0_106], %151 {strides = array<i32>} : memref<4x8x1xf32, #tpu.memory_space<vmem>>, vector<1x8x1xf32>,
    %152 = arith.truncf %142 : vector<8x8xf32> to vector<8x8xbf16>
    %cst_107 = arith.constant dense<0.000000e+00> : vector<8x8xf32>
    %153 = tpu.matmul %152, %129, %cst_107 {dimension_numbers = #tpu.dot_dimension_numbers<[1], [0], [0], [1], [0, 0, 1, 1], [], []>} : vector<8x8xbf16>, vector<8x8xbf16>, vector<8x8xf32> -> vector<8x8xf32>
    %c0_108 = arith.constant 0 : index
    %c24_109 = arith.constant 24 : index
    %154 = vector.load %arg10[%c0_108, %c24_109] : memref<8x32xf32, #tpu.memory_space<vmem>>, vector<8x8xf32>
    %155 = vector.broadcast %139 : vector<8x1xf32> to vector<8x8xf32>
    %156 = arith.mulf %155, %154 : vector<8x8xf32>
    %157 = arith.addf %156, %153 : vector<8x8xf32>
    %c0_110 = arith.constant 0 : index
    %c24_111 = arith.constant 24 : index
    %158 = vector.load %arg10[%c0_110, %c24_111] : memref<8x32xf32, #tpu.memory_space<vmem>>, vector<8x8xf32>
    tpu.vector_store %arg10[%c0_110, %c24_111], %157 {strides = array<i32>} : memref<8x32xf32, #tpu.memory_space<vmem>>, vector<8x8xf32>,
    %c3_112 = arith.constant 3 : index
    %c0_113 = arith.constant 0 : index
    %c0_114 = arith.constant 0 : index
    %159 = vector.load %arg8[%c3_112, %c0_113, %c0_114] : memref<4x8x1xf32, #tpu.memory_space<vmem>>, vector<1x8x1xf32>
    %160 = vector.shape_cast %159 : vector<1x8x1xf32> to vector<8x1xf32>
    %161 = vector.shape_cast %137 : vector<8x1xf32> to vector<1x8x1xf32>
    tpu.vector_store %arg8[%c3_112, %c0_113, %c0_114], %161 {strides = array<i32>} : memref<4x8x1xf32, #tpu.memory_space<vmem>>, vector<1x8x1xf32>,
    %c0_i32_115 = arith.constant 0 : i32
    %162 = arith.cmpi eq, %arg2, %c0_i32_115 : i32
    %163 = arith.extui %162 : i1 to i32
    %c0_i32_116 = arith.constant 0 : i32
    %164 = arith.cmpi ne, %163, %c0_i32_116 : i32
    scf.if %164 {
      %c0_117 = arith.constant 0 : index
      %c0_118 = arith.constant 0 : index
      %c0_119 = arith.constant 0 : index
      %165 = vector.load %arg9[%c0_117, %c0_118, %c0_119] : memref<4x8x1xf32, #tpu.memory_space<vmem>>, vector<1x8x1xf32>
      %166 = vector.shape_cast %165 : vector<1x8x1xf32> to vector<8x1xf32>
      %167 = tpu.reciprocal %166 {approx = true} : vector<8x1xf32> -> vector<8x1xf32>
      %c0_120 = arith.constant 0 : index
      %c0_121 = arith.constant 0 : index
      %168 = vector.load %arg10[%c0_120, %c0_121] : memref<8x32xf32, #tpu.memory_space<vmem>>, vector<8x8xf32>
      %169 = vector.broadcast %167 : vector<8x1xf32> to vector<8x8xf32>
      %170 = arith.mulf %168, %169 : vector<8x8xf32>
      %c0_122 = arith.constant 0 : index
      %c0_123 = arith.constant 0 : index
      %171 = vector.load %arg10[%c0_122, %c0_123] : memref<8x32xf32, #tpu.memory_space<vmem>>, vector<8x8xf32>
      tpu.vector_store %arg10[%c0_122, %c0_123], %170 {strides = array<i32>} : memref<8x32xf32, #tpu.memory_space<vmem>>, vector<8x8xf32>,
      %c1_124 = arith.constant 1 : index
      %c0_125 = arith.constant 0 : index
      %c0_126 = arith.constant 0 : index
      %172 = vector.load %arg9[%c1_124, %c0_125, %c0_126] : memref<4x8x1xf32, #tpu.memory_space<vmem>>, vector<1x8x1xf32>
      %173 = vector.shape_cast %172 : vector<1x8x1xf32> to vector<8x1xf32>
      %174 = tpu.reciprocal %173 {approx = true} : vector<8x1xf32> -> vector<8x1xf32>
      %c0_127 = arith.constant 0 : index
      %c8_128 = arith.constant 8 : index
      %175 = vector.load %arg10[%c0_127, %c8_128] : memref<8x32xf32, #tpu.memory_space<vmem>>, vector<8x8xf32>
      %176 = vector.broadcast %174 : vector<8x1xf32> to vector<8x8xf32>
      %177 = arith.mulf %175, %176 : vector<8x8xf32>
      %c0_129 = arith.constant 0 : index
      %c8_130 = arith.constant 8 : index
      %178 = vector.load %arg10[%c0_129, %c8_130] : memref<8x32xf32, #tpu.memory_space<vmem>>, vector<8x8xf32>
      tpu.vector_store %arg10[%c0_129, %c8_130], %177 {strides = array<i32>} : memref<8x32xf32, #tpu.memory_space<vmem>>, vector<8x8xf32>,
      %c2_131 = arith.constant 2 : index
      %c0_132 = arith.constant 0 : index
      %c0_133 = arith.constant 0 : index
      %179 = vector.load %arg9[%c2_131, %c0_132, %c0_133] : memref<4x8x1xf32, #tpu.memory_space<vmem>>, vector<1x8x1xf32>
      %180 = vector.shape_cast %179 : vector<1x8x1xf32> to vector<8x1xf32>
      %181 = tpu.reciprocal %180 {approx = true} : vector<8x1xf32> -> vector<8x1xf32>
      %c0_134 = arith.constant 0 : index
      %c16_135 = arith.constant 16 : index
      %182 = vector.load %arg10[%c0_134, %c16_135] : memref<8x32xf32, #tpu.memory_space<vmem>>, vector<8x8xf32>
      %183 = vector.broadcast %181 : vector<8x1xf32> to vector<8x8xf32>
      %184 = arith.mulf %182, %183 : vector<8x8xf32>
      %c0_136 = arith.constant 0 : index
      %c16_137 = arith.constant 16 : index
      %185 = vector.load %arg10[%c0_136, %c16_137] : memref<8x32xf32, #tpu.memory_space<vmem>>, vector<8x8xf32>
      tpu.vector_store %arg10[%c0_136, %c16_137], %184 {strides = array<i32>} : memref<8x32xf32, #tpu.memory_space<vmem>>, vector<8x8xf32>,
      %c3_138 = arith.constant 3 : index
      %c0_139 = arith.constant 0 : index
      %c0_140 = arith.constant 0 : index
      %186 = vector.load %arg9[%c3_138, %c0_139, %c0_140] : memref<4x8x1xf32, #tpu.memory_space<vmem>>, vector<1x8x1xf32>
      %187 = vector.shape_cast %186 : vector<1x8x1xf32> to vector<8x1xf32>
      %188 = tpu.reciprocal %187 {approx = true} : vector<8x1xf32> -> vector<8x1xf32>
      %c0_141 = arith.constant 0 : index
      %c24_142 = arith.constant 24 : index
      %189 = vector.load %arg10[%c0_141, %c24_142] : memref<8x32xf32, #tpu.memory_space<vmem>>, vector<8x8xf32>
      %190 = vector.broadcast %188 : vector<8x1xf32> to vector<8x8xf32>
      %191 = arith.mulf %189, %190 : vector<8x8xf32>
      %c0_143 = arith.constant 0 : index
      %c24_144 = arith.constant 24 : index
      %192 = vector.load %arg10[%c0_143, %c24_144] : memref<8x32xf32, #tpu.memory_space<vmem>>, vector<8x8xf32>
      tpu.vector_store %arg10[%c0_143, %c24_144], %191 {strides = array<i32>} : memref<8x32xf32, #tpu.memory_space<vmem>>, vector<8x8xf32>,
      %c0_145 = arith.constant 0 : index
      %c0_146 = arith.constant 0 : index
      %193 = vector.load %arg10[%c0_145, %c0_146] : memref<8x32xf32, #tpu.memory_space<vmem>>, vector<8x32xf32>
      %194 = arith.truncf %193 : vector<8x32xf32> to vector<8x32xbf16>
      %c0_147 = arith.constant 0 : index
      %c0_148 = arith.constant 0 : index
      %c0_149 = arith.constant 0 : index
      %195 = vector.load %arg7[%c0_147, %c0_148, %c0_149] : memref<1x8x32xbf16, #tpu.memory_space<vmem>>, vector<1x8x32xbf16>
      %196 = vector.shape_cast %195 : vector<1x8x32xbf16> to vector<8x32xbf16>
      %197 = vector.shape_cast %194 : vector<8x32xbf16> to vector<1x8x32xbf16>
      tpu.vector_store %arg7[%c0_147, %c0_148, %c0_149], %197 {strides = array<i32>} : memref<1x8x32xbf16, #tpu.memory_space<vmem>>, vector<1x8x32xbf16>,
    } else {
    }
    return
  }
  func.func @transform_0(%arg0: i32, %arg1: i32, %arg2: i32) -> (i32, i32, i32) {
    %c0_i32 = arith.constant 0 : i32
    %c0_i32_0 = arith.constant 0 : i32
    return %arg0, %c0_i32, %arg2 : i32, i32, i32
  }
  func.func @transform_1(%arg0: i32, %arg1: i32, %arg2: i32) -> (i32, i32, i32) {
    %c0_i32 = arith.constant 0 : i32
    %c0_i32_0 = arith.constant 0 : i32
    return %arg0, %arg1, %c0_i32 : i32, i32, i32
  }
  func.func @transform_2(%arg0: i32, %arg1: i32, %arg2: i32) -> (i32, i32, i32) {
    %c0_i32 = arith.constant 0 : i32
    %c0_i32_0 = arith.constant 0 : i32
    return %arg0, %arg2, %c0_i32 : i32, i32, i32
  }
  func.func @transform_3(%arg0: i32, %arg1: i32, %arg2: i32) -> (i32, i32, i32) {
    %c0_i32 = arith.constant 0 : i32
    %c0_i32_0 = arith.constant 0 : i32
    return %arg0, %arg2, %c0_i32 : i32, i32, i32
  }
  func.func @transform_4(%arg0: i32, %arg1: i32, %arg2: i32) -> (i32, i32, i32) {
    %c0_i32 = arith.constant 0 : i32
    %c0_i32_0 = arith.constant 0 : i32
    return %arg0, %arg1, %c0_i32 : i32, i32, i32
  }
}

</mosaic_0001>

<bundles_post_ra>
// kernel: tpu_custom_call.1
= control target key start
LH: loop header
LB: loop body
LE: loop exit
PB: predicated region body
PF: predicated region fallthrough
CT: control target
= control target key end

     0   :  { %6 = vsyncpa [#allocation3], 0  ;;  %s287_s0 = inlined_call_operand.hbm [shape: f32[8,128], index: 0, kind: input, shape index: {}]   ;;  %s288_s1 = inlined_call_operand.hbm [shape: f32[8,128], index: 1, kind: output, shape index: {}]  }
   0x1   :  { %7 = vsyncpa [#allocation4], 0  ;;  %s270_s6 = smov 0  }
   0x2 LB: > { %s149_s7 = sadd.s32 4294967295, %s256_s6   ;;  %p150_p0 = scmp.ge.s32.totalorder %s256_s6, 1  ;;  %s256_s6 = sphi %s270_s6, %s13_s6  }
   0x3   : > { %p60_p1 = scmp.lt.s32.totalorder %s256_s6, 3  ;;  %s72_s10 = sshll.u32 %s287_s0, 4  ;;  %s73_s10 = int_to_ptr.hbm [resolvable:$true] %s72_s10 }
   0x4   : > { %p170_p3 = scmp.eq.s32.totalorder %s149_s7, 0  ;;  %s258_s11 = smov [#allocation2]  }
   0x5   : > { %p61_p2 = pnand %p150_p0, %p60_p1  ;;  %s74_s12 = sshll.u32 %s258_s11, 4  ;;  %s75_s12 = int_to_ptr.vmem [resolvable:$true] %s74_s12 }
   0x7   : > { %p166_p4 = pneg %p61_p2  ;;  %87 = sbr.rel (%p61_p2) target bundleno = 20 (0x14), region = 24 }
   0x9   : > { %p167_p5 = pnand %p170_p3, %p166_p4 }
   0xb   : > { %169 = dma.hbm_to_vmem [thread:$0]  (!%p167_p5), %s73_s10, 128, %s75_s12, [#allocation3]  }
   0xc   : > { %247 = dma.done.wait (%p170_p3), [#allocation3], 128  }
   0xd   : > { %249 = vsyncadd (%p170_p3), [#allocation3], 4294967168  ;;  %s259_s13 = smov [#allocation5]   ;;  %s109_s17 = sshll.u32 %s288_s1, 4  ;;  %v98_v0 = vld [vmem:[#allocation2] sm:$0xff]  ;;  %s110_s17 = int_to_ptr.hbm [resolvable:$true] %s109_s17 }
   0xe   : > { %s107_s14 = sshll.u32 %s259_s13, 4  ;;  %p172_p6 = scmp.eq.s32.totalorder %s149_s7, 1  ;;  %v99_v1 = vadd.f32 1.0, %v98_v0  ;;  %s108_s14 = int_to_ptr.vmem [resolvable:$true] %s107_s14 }
  0x10   : > { %100 = vst [vmem:[#allocation5] sm:$0xff] %v99_v1 }
  0x11   : > { %163 = dma.vmem_to_hbm [thread:$0]  (%p172_p6), %s108_s14, 128, %s110_s17, [#allocation4]  }
  0x12   : > { %251 = dma.done.wait (%p172_p6), [#allocation4], 128  }
  0x13   : > { %253 = vsyncadd (%p172_p6), [#allocation4], 4294967168 }
  0x14 PF: > { %s13_s6 = sadd.s32 1, %s256_s6  }
  0x15   : > { %p10_p7 = scmp.ge.s32.totalorder %s13_s6, 4  }
  0x17   :  { %12 = sbr.rel (!%p10_p7) target bundleno = 2 (0x2), region = 53 }
  0x1c   :  { %123 = vsyncpa [#allocation3], 1 }
  0x1d   :  { %125 = vsyncpa [#allocation3 + $0x1], 1 }
  0x1e   :  { %126 = vsyncpa [#allocation4], 1 }
  0x1f   :  { %128 = vsyncpa [#allocation4 + $0x1], 1 }

// kernel: encoder_layer_forward.5
= control target key start
LH: loop header
LB: loop body
LE: loop exit
PB: predicated region body
PF: predicated region fallthrough
CT: control target
= control target key end

     0   :  { %s562_s0 = inlined_call_operand.vmem [shape: bf16[16,32], index: 0, kind: input, shape index: {}]   ;;  %s563_s1 = inlined_call_operand.vmem [shape: f32[16,32], index: 1, kind: input, shape index: {}]   ;;  %s564_s2 = inlined_call_operand.vmem [shape: f32[1,32], index: 2, kind: input, shape index: {}]   ;;  %s565_s3 = inlined_call_operand.vmem [shape: f32[1,32], index: 3, kind: input, shape index: {}]   ;;  %s566_s4 = inlined_call_operand.vmem [shape: bf16[32,32], index: 4, kind: input, shape index: {}]   ;;  %s567_s5 = inlined_call_operand.vmem [shape: f32[1,32], index: 5, kind: input, shape index: {}]   ;;  %s568_s6 = inlined_call_operand.vmem [shape: bf16[32,64], index: 6, kind: input, shape index: {}]   ;;  %s569_s7 = inlined_call_operand.vmem [shape: f32[1,64], index: 7, kind: input, shape index: {}]   ;;  %s570_s8 = inlined_call_operand.vmem [shape: bf16[64,32], index: 8, kind: input, shape index: {}]   ;;  %s571_s9 = inlined_call_operand.vmem [shape: f32[1,32], index: 9, kind: input, shape index: {}]   ;;  %s572_s10 = inlined_call_operand.hbm [shape: f32[16,32], index: 10, kind: output, shape index: {}]  }
   0x1   :  { %v378_v0 = vld [vmem:[%s566_s4 + $0x8] sm:$0xff]  ;;  %v377_v1 = vld [vmem:[%s566_s4] sm:$0xff] }
   0x2   :  { %78 = vmatpush.bf16.msra.mxu0 %v378_v0 }
   0x3   :  { %15 = vsyncpa [#allocation6], 0  ;;  %v376_v2 = vld [vmem:[%s562_s0] sm:$0xff]  ;;  %vm68_vm0 = vcmask 261120   ;;  %v87_v10 = vld [vmem:[%s563_s1 + $0x8] sm:$0xff]  ;;  %v432_v14 = vmov 32.0  }
   0x4   :  { %v391_v3 = vld [vmem:[%s567_s5] ss:$0 sm:$0xff]  ;;  %396 = vrcp.f32 %v432_v14  ;;  %v381_v43 = vld [vmem:[%s568_s6 + $0x8] sm:$0xff]  ;;  %vm189_vm11 = vcmask 257024   ;;  %vm276_vm15 = vcmask 523264   ;;  %s321_s20 = sshll.u32 %s572_s10, 4  ;;  %s322_s20 = int_to_ptr.hbm [resolvable:$true] %s321_s20 }
   0x5   :  { %v86_v5 = vld [vmem:[%s563_s1] sm:$0xff]  ;;  %231 = vmatpush.bf16.msra.mxu1 %v381_v43  ;;  %s436_s21 = smov 8  }
   0x6   :  { %79 = vmatpush.bf16.msra.mxu0 %v377_v1  ;;  %v380_v47 = vld [vmem:[%s568_s6] sm:$0xff] }
   0x7   :  { %v392_v63 = vld [vmem:[%s564_s2] ss:$0 sm:$0xff] }
   0x8   :  { %v395_v43 = vld [vmem:[%s571_s9] ss:$0 sm:$0xff]  ;;  %s435_s9 = smov 128  }
   0x9   :  { %345 = vmatmul.msk.bf16.vlgmr.msra.gmra.mxu0 %vm68_vm0, %v376_v2  ;;  %232 = vmatpush.bf16.msra.mxu1 %v380_v47 }
   0xa   :  { %v397_v15 = vpop.eup %396 }
   0xb   :  { %v101_v16 = vmul.f32 32.0, %v397_v15  ;;  %vm105_vm1 = vweird.f32 %v397_v15 }
   0xd   :  { %v102_v17 = vsub.f32 1.0, %v101_v16 }
   0xf   :  { %v103_v18 = vmul.f32 %v397_v15, %v102_v17 }
  0x11   :  { %v104_v19 = vadd.f32 %v397_v15, %v103_v18 }
  0x13   :  { %v106_v20 = vsel %vm105_vm1, %v397_v15, %v104_v19 }
  0x86   :  { %v81_v4 = vpop.f32.mrf.mxu0 }
  0x87   :  { %v82_v6 = vadd.f32 %v391_v3, %v81_v4 }
  0x89   :  { %v88_v7 = vadd.f32 %v86_v5, %v82_v6 }
  0x8b   :  { %90 = vst.msk [vmem:[#allocation2] sm:$0xff] %vm68_vm0, %v88_v7  ;;  %v94_v8 = vsel %vm68_vm0, %v88_v7, 0.0 }
  0x8c   :  { %95 = vadd.xlane.f32.xlu0 %v94_v8 }
  0x8e   :  { %v83_v9 = vpop.f32.mrf.mxu0 }
  0x8f   :  { %v84_v11 = vadd.f32 %v391_v3, %v83_v9 }
  0x91   :  { %v89_v12 = vadd.f32 %v87_v10, %v84_v11 }
  0x93   :  { %91 = vst.msk [vmem:[#allocation2 + $0x8] sm:$0xff] %vm68_vm0, %v89_v12  ;;  %v97_v13 = vsel %vm68_vm0, %v89_v12, 0.0 }
  0x94   :  { %98 = vadd.xlane.f32.xlu0 %v97_v13 }
  0xff   :  { %v96_v21 = vpop.xlane.xlu0 %95 }
 0x100   :  { %v107_v22 = vmul.f32 %v106_v20, %v96_v21 }
 0x102   :  { %v109_v23 = vsub.f32 %v88_v7, %v107_v22  ;;  %v393_v7 = vld [vmem:[%s565_s3] ss:$0 sm:$0xff] }
 0x104   :  { %v111_v24 = vmul.f32 %v109_v23, %v109_v23  ;;  %v124_v5 = vmul.f32 %v392_v63, %v109_v23 }
 0x106   :  { %v113_v25 = vsel %vm68_vm0, %v111_v24, 0.0 }
 0x107   :  { %114 = vadd.xlane.f32.xlu1 %v113_v25  ;;  %v99_v26 = vpop.xlane.xlu0 %98 }
 0x108   :  { %v108_v27 = vmul.f32 %v106_v20, %v99_v26  ;;  %v385_v26 = vld [vmem:[%s570_s8 + $0x18] sm:$0xff] }
 0x109   :  { %284 = vmatpush.bf16.msra.mxu2 %v385_v26 }
 0x10a   :  { %v516_v28 = vsub.f32 %v89_v12, %v108_v27  ;;  %v384_v27 = vld [vmem:[%s570_s8 + $0x10] sm:$0xff] }
 0x10c   :  { %v112_v29 = vmul.f32 %v516_v28, %v516_v28  ;;  %v125_v19 = vmul.f32 %v392_v63, %v516_v28  ;;  %v383_v28 = vld [vmem:[%s570_s8 + $0x8] sm:$0xff] }
 0x10d   :  { %285 = vmatpush.bf16.msra.mxu2 %v384_v27 }
 0x10e   :  { %v116_v30 = vsel %vm68_vm0, %v112_v29, 0.0  ;;  %v382_v29 = vld [vmem:[%s570_s8] sm:$0xff] }
 0x10f   :  { %117 = vadd.xlane.f32.xlu1 %v116_v30  ;;  %v433_v30 = vmov 0.0  }
 0x110   :  { %192 = vst.msk [vmem:[#allocation4] sm:$0xff] %vm68_vm0, %v433_v30 }
 0x111   :  { %286 = vmatpush.bf16.msra.mxu2 %v383_v28  ;;  %193 = vst.msk [vmem:[#allocation4 + $0x8] sm:$0xff] %vm68_vm0, %v433_v30 }
 0x115   :  { %287 = vmatpush.bf16.msra.mxu2 %v382_v29 }
 0x17a   :  { %v115_v31 = vpop.xlane.xlu1 %114 }
 0x17b   :  { %v119_v32 = vmul.f32 0.032258064, %v115_v31 }
 0x17d   :  { %398 = vrsqrt.f32 %v119_v32  ;;  %vm133_vm2 = vcmp.eq.f32.partialorder %v119_v32, inf  ;;  %v136_v46 = vand.u32 2147483648, %v119_v32  ;;  %vm135_vm3 = vcmp.eq.f32.partialorder %v119_v32, 0.0 }
 0x182   :  { %v118_v33 = vpop.xlane.xlu1 %117 }
 0x183   :  { %v399_v34 = vpop.eup %398  ;;  %v120_v35 = vmul.f32 0.032258064, %v118_v33 }
 0x184   :  { %v127_v36 = vmul.f32 %v399_v34, %v119_v32 }
 0x185   :  { %400 = vrsqrt.f32 %v120_v35  ;;  %vm145_vm4 = vcmp.eq.f32.partialorder %v120_v35, inf  ;;  %v148_v55 = vand.u32 2147483648, %v120_v35  ;;  %vm147_vm5 = vcmp.eq.f32.partialorder %v120_v35, 0.0 }
 0x186   :  { %v128_v37 = vmul.f32 %v399_v34, %v127_v36 }
 0x188   :  { %v129_v38 = vmul.f32 0.5, %v128_v37 }
 0x18a   :  { %v130_v39 = vsub.f32 1.5, %v129_v38 }
 0x18b   :  { %v401_v40 = vpop.eup %400 }
 0x18c   :  { %v131_v41 = vmul.f32 %v399_v34, %v130_v39  ;;  %v139_v42 = vmul.f32 %v401_v40, %v120_v35  ;;  %v241_v39 = vld [vmem:[#allocation4] sm:$0xff] }
 0x18e   :  { %v132_v44 = vmul.f32 %v131_v41, %v119_v32  ;;  %v140_v45 = vmul.f32 %v401_v40, %v139_v42  ;;  %v242_v42 = vld [vmem:[#allocation4 + $0x8] sm:$0xff] }
 0x190   :  { %v134_v48 = vsel %vm133_vm2, %v119_v32, %v132_v44  ;;  %v141_v49 = vmul.f32 0.5, %v140_v45  ;;  %v394_v32 = vld [vmem:[%s569_s7] ss:$0 sm:$0xff]  ;;  %s434_s7 = smov [#allocation5]  }
 0x191   :  { %v137_v50 = vsel %vm135_vm3, %v136_v46, %v134_v48  ;;  %v309_v48 = vld [vmem:[#allocation2] sm:$0xff]  ;;  %s319_s17 = sshll.u32 %s434_s7, 4  ;;  %s320_s17 = int_to_ptr.vmem [resolvable:$true] %s319_s17 }
 0x192   :  { %v150_v51 = vadd.f32 1e-06, %v137_v50  ;;  %v142_v52 = vsub.f32 1.5, %v141_v49 }
 0x194   :  { %402 = vrcp.f32 %v150_v51  ;;  %v143_v53 = vmul.f32 %v401_v40, %v142_v52  ;;  %v163_v62 = vand.u32 2147483648, %v150_v51  ;;  %v161_v1 = vand.u32 2147483647, %v150_v51  ;;  %v310_v52 = vld [vmem:[#allocation2 + $0x8] sm:$0xff] }
 0x195   :  { %vm157_vm7 = vweird.f32 %v150_v51 }
 0x196   :  { %v144_v54 = vmul.f32 %v143_v53, %v120_v35  ;;  %v164_v3 = vor.u32 1.1754944e-38, %v163_v62  ;;  %vm162_vm9 = vcmp.eq.f32.partialorder %v161_v1, 8.507059e+37 }
 0x198   :  { %v146_v56 = vsel %vm145_vm4, %v120_v35, %v144_v54 }
 0x199   :  { %v149_v58 = vsel %vm147_vm5, %v148_v55, %v146_v56 }
 0x19a   :  { %v403_v57 = vpop.eup %402  ;;  %v151_v60 = vadd.f32 1e-06, %v149_v58 }
 0x19b   :  { %v153_v59 = vmul.f32 %v403_v57, %v150_v51  ;;  %vm158_vm6 = vweird.f32 %v403_v57 }
 0x19c   :  { %404 = vrcp.f32 %v151_v60  ;;  %vm159_vm8 = vmor %vm157_vm7, %vm158_vm6  ;;  %v178_v12 = vand.u32 2147483648, %v151_v60  ;;  %v176_v15 = vand.u32 2147483647, %v151_v60  ;;  %vm172_vm12 = vweird.f32 %v151_v60 }
 0x19d   :  { %v154_v61 = vsub.f32 1.0, %v153_v59 }
 0x19e   :  { %v179_v18 = vor.u32 1.1754944e-38, %v178_v12  ;;  %vm177_vm14 = vcmp.eq.f32.partialorder %v176_v15, 8.507059e+37 }
 0x19f   :  { %v155_v0 = vmul.f32 %v403_v57, %v154_v61 }
 0x1a1   :  { %v156_v2 = vadd.f32 %v403_v57, %v155_v0 }
 0x1a2   :  { %v405_v4 = vpop.eup %404 }
 0x1a3   :  { %v160_v6 = vsel %vm159_vm8, %v403_v57, %v156_v2  ;;  %v168_v8 = vmul.f32 %v405_v4, %v151_v60  ;;  %vm173_vm10 = vweird.f32 %v405_v4 }
 0x1a4   :  { %v165_v9 = vsel %vm162_vm9, %v164_v3, %v160_v6  ;;  %vm174_vm13 = vmor %vm172_vm12, %vm173_vm10 }
 0x1a5   :  { %v166_v10 = vmul.f32 %v165_v9, %v124_v5  ;;  %v169_v11 = vsub.f32 1.0, %v168_v8 }
 0x1a7   :  { %v185_v13 = vadd.f32 %v393_v7, %v166_v10  ;;  %v170_v14 = vmul.f32 %v405_v4, %v169_v11 }
 0x1a9   :  { %v187_v16 = vpack.c.bf16 %v185_v13, %v185_v13  ;;  %v171_v17 = vadd.f32 %v405_v4, %v170_v14 }
 0x1ab   :  { %190 = vst.msk [vmem:[#allocation3] sm:$0xf] %vm189_vm11, %v187_v16  ;;  %v175_v20 = vsel %vm174_vm13, %v405_v4, %v171_v17 }
 0x1ac   :  { %v180_v21 = vsel %vm177_vm14, %v179_v18, %v175_v20 }
 0x1ad   :  { %v181_v22 = vmul.f32 %v180_v21, %v125_v19 }
 0x1af   :  { %v186_v23 = vadd.f32 %v393_v7, %v181_v22 }
 0x1b1   :  { %v188_v24 = vpack.c.bf16 %v186_v23, %v186_v23 }
 0x1b3   :  { %191 = vst.msk [vmem:[#allocation3 + $0x4] sm:$0xf] %vm189_vm11, %v188_v24 }
 0x1ba   :  { %v379_v25 = vld [vmem:[#allocation3] sm:$0xff] }
 0x1bb   :  { %358 = vmatmul.msk.bf16.vlgmr.msra.gmra.mxu1 %vm68_vm0, %v379_v25 }
 0x238   :  { %v234_v31 = vpop.f32.mrf.mxu1 }
 0x239   :  { %v235_v33 = vadd.f32 %v394_v32, %v234_v31 }
 0x23b   :  { %v239_v36 = vmax.f32 %v235_v33, 0.0 }
 0x240   :  { %v236_v34 = vpop.f32.mrf.mxu1 }
 0x241   :  { %v237_v35 = vadd.f32 %v394_v32, %v236_v34 }
 0x243   :  { %v240_v37 = vmax.f32 %v237_v35, 0.0 }
 0x245   :  { %v243_v38 = vpack.c.bf16 %v240_v37, %v239_v36 }
 0x247   :  { %375 = vmatmul.msk.bf16.vlgmr.msra.gmra.mxu2 %vm276_vm15, %v243_v38 }
 0x2ca   :  { %v289_v40 = vpop.f32.mrf.mxu2 }
 0x2cb   :  { %v294_v41 = vadd.f32 %v289_v40, %v241_v39 }
 0x2cd   :  { %296 = vst.msk [vmem:[#allocation4] sm:$0xff] %vm68_vm0, %v294_v41 }
 0x2d2   :  { %v291_v44 = vpop.f32.mrf.mxu2 }
 0x2d3   :  { %v295_v45 = vadd.f32 %v291_v44, %v242_v42 }
 0x2d4   :  { %v301_v46 = vld [vmem:[#allocation4] sm:$0xff] }
 0x2d5   :  { %297 = vst.msk [vmem:[#allocation4 + $0x8] sm:$0xff] %vm68_vm0, %v295_v45  ;;  %v307_v47 = vadd.f32 %v395_v43, %v301_v46 }
 0x2d7   :  { %v311_v49 = vadd.f32 %v309_v48, %v307_v47 }
 0x2d9   :  { %313 = vst.msk [vmem:[#allocation5] sm:$0xff] %vm68_vm0, %v311_v49 }
 0x2dc   :  { %v302_v50 = vld [vmem:[#allocation4 + $0x8] sm:$0xff] }
 0x2dd   :  { %v308_v51 = vadd.f32 %v395_v43, %v302_v50 }
 0x2df   :  { %v312_v53 = vadd.f32 %v310_v52, %v308_v51 }
 0x2e1   :  { %314 = vst.msk [vmem:[#allocation5 + $0x8] sm:$0xff] %vm68_vm0, %v312_v53 }
 0x2e2   :  { %327 = dma.vmem_to_hbm [thread:$0]  %s320_s17, 256, %s322_s20, [#allocation6], %s435_s9, %s435_s9, %s436_s21  }
 0x2e3   :  { %430 = dma.done.wait [#allocation6], 256  }
 0x2e4   :  { %431 = vsyncadd [#allocation6], 4294967040 }
 0x2e5   :  { %332 = vsyncpa [#allocation6], 1 }

// kernel: encoder_layer_forward.3
= control target key start
LH: loop header
LB: loop body
LE: loop exit
PB: predicated region body
PF: predicated region fallthrough
CT: control target
= control target key end

     0   :  { %13 = vsyncpa [#allocation3], 0  ;;  %s419_s0 = inlined_call_operand.hbm [shape: f32[16,32], index: 0, kind: input, shape index: {}]   ;;  %s420_s1 = inlined_call_operand.vmem [shape: f32[1,32], index: 1, kind: input, shape index: {}]   ;;  %s421_s2 = inlined_call_operand.vmem [shape: f32[1,32], index: 2, kind: input, shape index: {}]   ;;  %s422_s3 = inlined_call_operand.hbm [shape: bf16[32,96], index: 3, kind: input, shape index: {}]   ;;  %s423_s4 = inlined_call_operand.vmem [shape: f32[1,96], index: 4, kind: input, shape index: {}]   ;;  %s424_s5 = inlined_call_operand.vmem [shape: bf16[16,32], index: 5, kind: output, shape index: {0}]   ;;  %s425_s6 = inlined_call_operand.vmem [shape: bf16[16,32], index: 6, kind: output, shape index: {1}]   ;;  %s426_s7 = inlined_call_operand.vmem [shape: bf16[16,32], index: 7, kind: output, shape index: {2}]  }
   0x1   :  { %s19_s26 = sshll.u32 %s419_s0, 4  ;;  %s20_s26 = int_to_ptr.hbm [resolvable:$true] %s19_s26 }
   0x2   :  { %14 = vsyncpa [#allocation5], 0  ;;  %s313_s27 = smov [#allocation2]   ;;  %s36_s8 = sshll.u32 %s422_s3, 4  ;;  %s37_s8 = int_to_ptr.hbm [resolvable:$true] %s36_s8 }
   0x3   :  { %s21_s28 = sshll.u32 %s313_s27, 4  ;;  %s314_s9 = smov 128   ;;  %s22_s28 = int_to_ptr.vmem [resolvable:$true] %s21_s28 }
   0x4   :  { %s315_s10 = smov 8   ;;  %s316_s11 = smov [#allocation4]  }
   0x5   :  { %27 = dma.hbm_to_vmem [thread:$0]  %s20_s26, 256, %s22_s28, [#allocation3], %s314_s9, %s314_s9, %s315_s10  }
   0x6   :  { %s38_s12 = sshll.u32 %s316_s11, 4  ;;  %s317_s13 = smov 64   ;;  %s39_s12 = int_to_ptr.vmem [resolvable:$true] %s38_s12 }
   0x7   :  { %s318_s14 = smov 4  }
   0x8   :  { %44 = dma.hbm_to_vmem [thread:$0]  %s37_s8, 256, %s39_s12, [#allocation5], %s317_s13, %s317_s13, %s318_s14  }
   0x9   :  { %309 = dma.done.wait [#allocation3], 256  }
   0xa   :  { %310 = vsyncadd [#allocation3], 4294967040 }
   0xb   :  { %311 = dma.done.wait [#allocation5], 256  }
   0xc   :  { %312 = vsyncadd [#allocation5], 4294967040  ;;  %vm60_vm0 = vcmask 261120   ;;  %v56_v0 = vld [vmem:[#allocation2] sm:$0xff]  ;;  %v57_v2 = vld [vmem:[#allocation2 + $0x8] sm:$0xff]  ;;  %v319_v4 = vmov 32.0  }
   0xd   :  { %v61_v1 = vsel %vm60_vm0, %v56_v0, 0.0  ;;  %v64_v3 = vsel %vm60_vm0, %v57_v2, 0.0  ;;  %251 = vrcp.f32 %v319_v4  ;;  %v239_v21 = vld [vmem:[#allocation4 + $0x8] sm:$0xff]  ;;  %v238_v23 = vld [vmem:[#allocation4] sm:$0xff]  ;;  %v248_v58 = vld [vmem:[%s420_s1] ss:$0 sm:$0xff] }
   0xe   :  { %62 = vadd.xlane.f32.xlu0 %v61_v1  ;;  %184 = vmatpush.bf16.msra.mxu0 %v239_v21  ;;  %vm194_vm14 = vcmask 257024  }
  0x12   :  { %185 = vmatpush.bf16.msra.mxu0 %v238_v23 }
  0x13   :  { %v252_v5 = vpop.eup %251 }
  0x14   :  { %v68_v6 = vmul.f32 32.0, %v252_v5  ;;  %vm72_vm1 = vweird.f32 %v252_v5 }
  0x16   :  { %65 = vadd.xlane.f32.xlu0 %v64_v3  ;;  %v69_v7 = vsub.f32 1.0, %v68_v6 }
  0x18   :  { %v70_v8 = vmul.f32 %v252_v5, %v69_v7 }
  0x1a   :  { %v71_v9 = vadd.f32 %v252_v5, %v70_v8  ;;  %v249_v8 = vld [vmem:[%s421_s2] ss:$0 sm:$0xff]  ;;  %s320_s2 = smov 96  }
  0x1c   :  { %v73_v10 = vsel %vm72_vm1, %v252_v5, %v71_v9 }
  0x81   :  { %v63_v11 = vpop.xlane.xlu0 %62 }
  0x82   :  { %v74_v12 = vmul.f32 %v73_v10, %v63_v11 }
  0x84   :  { %v371_v13 = vsub.f32 %v56_v0, %v74_v12 }
  0x86   :  { %v78_v14 = vmul.f32 %v371_v13, %v371_v13 }
  0x88   :  { %v80_v15 = vsel %vm60_vm0, %v78_v14, 0.0 }
  0x89   :  { %81 = vadd.xlane.f32.xlu1 %v80_v15  ;;  %v66_v16 = vpop.xlane.xlu0 %65 }
  0x8a   :  { %v75_v17 = vmul.f32 %v73_v10, %v66_v16 }
  0x8c   :  { %v376_v18 = vsub.f32 %v57_v2, %v75_v17  ;;  %v91_v2 = vmul.f32 %v248_v58, %v371_v13  ;;  %v250_v13 = vld [vmem:[%s423_s4] ss:$0 sm:$0xff] }
  0x8e   :  { %v79_v19 = vmul.f32 %v376_v18, %v376_v18  ;;  %v92_v5 = vmul.f32 %v248_v58, %v376_v18 }
  0x90   :  { %v83_v20 = vsel %vm60_vm0, %v79_v19, 0.0 }
  0x91   :  { %84 = vadd.xlane.f32.xlu1 %v83_v20 }
  0xfc   :  { %v82_v22 = vpop.xlane.xlu1 %81 }
  0xfd   :  { %v86_v24 = vmul.f32 0.032258064, %v82_v22 }
  0xff   :  { %253 = vrsqrt.f32 %v86_v24  ;;  %vm100_vm2 = vcmp.eq.f32.partialorder %v86_v24, inf  ;;  %v103_v37 = vand.u32 2147483648, %v86_v24  ;;  %vm102_vm3 = vcmp.eq.f32.partialorder %v86_v24, 0.0 }
 0x104   :  { %v85_v25 = vpop.xlane.xlu1 %84 }
 0x105   :  { %v254_v26 = vpop.eup %253  ;;  %v87_v27 = vmul.f32 0.032258064, %v85_v25 }
 0x106   :  { %v94_v28 = vmul.f32 %v254_v26, %v86_v24 }
 0x107   :  { %255 = vrsqrt.f32 %v87_v27  ;;  %vm112_vm4 = vcmp.eq.f32.partialorder %v87_v27, inf  ;;  %v115_v45 = vand.u32 2147483648, %v87_v27  ;;  %vm114_vm5 = vcmp.eq.f32.partialorder %v87_v27, 0.0 }
 0x108   :  { %v95_v29 = vmul.f32 %v254_v26, %v94_v28 }
 0x10a   :  { %v96_v30 = vmul.f32 0.5, %v95_v29 }
 0x10c   :  { %v97_v31 = vsub.f32 1.5, %v96_v30 }
 0x10d   :  { %v256_v32 = vpop.eup %255 }
 0x10e   :  { %v98_v33 = vmul.f32 %v254_v26, %v97_v31  ;;  %v106_v34 = vmul.f32 %v256_v32, %v87_v27 }
 0x110   :  { %v99_v35 = vmul.f32 %v98_v33, %v86_v24  ;;  %v107_v36 = vmul.f32 %v256_v32, %v106_v34 }
 0x112   :  { %v101_v38 = vsel %vm100_vm2, %v86_v24, %v99_v35  ;;  %v108_v39 = vmul.f32 0.5, %v107_v36 }
 0x113   :  { %v104_v40 = vsel %vm102_vm3, %v103_v37, %v101_v38 }
 0x114   :  { %v109_v41 = vsub.f32 1.5, %v108_v39  ;;  %v117_v42 = vadd.f32 1e-06, %v104_v40 }
 0x116   :  { %v110_v43 = vmul.f32 %v256_v32, %v109_v41  ;;  %257 = vrcp.f32 %v117_v42  ;;  %v130_v55 = vand.u32 2147483648, %v117_v42  ;;  %vm124_vm7 = vweird.f32 %v117_v42 }
 0x117   :  { %v128_v56 = vand.u32 2147483647, %v117_v42 }
 0x118   :  { %v111_v44 = vmul.f32 %v110_v43, %v87_v27  ;;  %v131_v61 = vor.u32 1.1754944e-38, %v130_v55 }
 0x119   :  { %vm129_vm9 = vcmp.eq.f32.partialorder %v128_v56, 8.507059e+37 }
 0x11a   :  { %v113_v46 = vsel %vm112_vm4, %v87_v27, %v111_v44 }
 0x11b   :  { %v116_v47 = vsel %vm114_vm5, %v115_v45, %v113_v46 }
 0x11c   :  { %v258_v48 = vpop.eup %257  ;;  %v118_v49 = vadd.f32 1e-06, %v116_v47 }
 0x11d   :  { %v120_v50 = vmul.f32 %v258_v48, %v117_v42  ;;  %vm125_vm6 = vweird.f32 %v258_v48 }
 0x11e   :  { %259 = vrcp.f32 %v118_v49  ;;  %vm126_vm8 = vmor %vm124_vm7, %vm125_vm6  ;;  %v145_v62 = vand.u32 2147483648, %v118_v49  ;;  %v143_v0 = vand.u32 2147483647, %v118_v49  ;;  %vm139_vm11 = vweird.f32 %v118_v49 }
 0x11f   :  { %v121_v51 = vsub.f32 1.0, %v120_v50 }
 0x120   :  { %v146_v4 = vor.u32 1.1754944e-38, %v145_v62  ;;  %vm144_vm13 = vcmp.eq.f32.partialorder %v143_v0, 8.507059e+37 }
 0x121   :  { %v122_v52 = vmul.f32 %v258_v48, %v121_v51 }
 0x123   :  { %v123_v53 = vadd.f32 %v258_v48, %v122_v52 }
 0x124   :  { %v260_v54 = vpop.eup %259 }
 0x125   :  { %v135_v57 = vmul.f32 %v260_v54, %v118_v49  ;;  %v127_v59 = vsel %vm126_vm8, %v258_v48, %v123_v53  ;;  %vm140_vm10 = vweird.f32 %v260_v54 }
 0x126   :  { %v132_v1 = vsel %vm129_vm9, %v131_v61, %v127_v59  ;;  %vm141_vm12 = vmor %vm139_vm11, %vm140_vm10 }
 0x127   :  { %v136_v60 = vsub.f32 1.0, %v135_v57  ;;  %v133_v6 = vmul.f32 %v132_v1, %v91_v2 }
 0x129   :  { %v137_v63 = vmul.f32 %v260_v54, %v136_v60  ;;  %v152_v11 = vadd.f32 %v249_v8, %v133_v6 }
 0x12b   :  { %v138_v3 = vadd.f32 %v260_v54, %v137_v63 }
 0x12d   :  { %v142_v7 = vsel %vm141_vm12, %v260_v54, %v138_v3 }
 0x12e   :  { %v147_v9 = vsel %vm144_vm13, %v146_v4, %v142_v7 }
 0x12f   :  { %v148_v10 = vmul.f32 %v147_v9, %v92_v5 }
 0x131   :  { %v153_v12 = vadd.f32 %v249_v8, %v148_v10 }
 0x133   :  { %v154_v14 = vpack.c.bf16 %v153_v12, %v152_v11 }
 0x135   :  { %237 = vmatmul.msk.bf16.vlgmr.msra.gmra.mxu0 %vm60_vm0, %v154_v14 }
 0x1b2   :  { %v187_v15 = vpop.f32.mrf.mxu0 }
 0x1b3   :  { %v188_v16 = vadd.f32 %v250_v13, %v187_v15 }
 0x1b5   :  { %v192_v17 = vpack.c.bf16 %v188_v16, %v188_v16 }
 0x1b7   :  { %195 = vst.msk [vmem:[%s424_s5] sm:$0xf] %vm194_vm14, %v192_v17  ;;  %207 = vrot.lane.b32.xlu0 %v192_v17, %s317_s13  ;;  %199 = vrot.lane.b32.xlu2 %v192_v17, %s320_s2 }
 0x1ba   :  { %v189_v18 = vpop.f32.mrf.mxu0 }
 0x1bb   :  { %v190_v19 = vadd.f32 %v250_v13, %v189_v18 }
 0x1bd   :  { %v193_v20 = vpack.c.bf16 %v190_v19, %v190_v19 }
 0x1bf   :  { %196 = vst.msk [vmem:[%s424_s5 + $0x4] sm:$0xf] %vm194_vm14, %v193_v20  ;;  %209 = vrot.lane.b32.xlu1 %v193_v20, %s317_s13  ;;  %201 = vrot.lane.b32.xlu2 %v193_v20, %s320_s2 }
 0x211   :  { %v200_v21 = vpop.permute.xlu2 %199 }
 0x212   :  { %205 = vst.msk [vmem:[%s425_s6] sm:$0xf] %vm194_vm14, %v200_v21 }
 0x219   :  { %v202_v22 = vpop.permute.xlu2 %201 }
 0x21a   :  { %206 = vst.msk [vmem:[%s425_s6 + $0x4] sm:$0xf] %vm194_vm14, %v202_v22 }
 0x229   :  { %v208_v23 = vpop.permute.xlu0 %207 }
 0x22a   :  { %213 = vst.msk [vmem:[%s426_s7] sm:$0xf] %vm194_vm14, %v208_v23 }
 0x231   :  { %v210_v24 = vpop.permute.xlu1 %209 }
 0x232   :  { %214 = vst.msk [vmem:[%s426_s7 + $0x4] sm:$0xf] %vm194_vm14, %v210_v24 }
 0x233   :  { %227 = vsyncpa [#allocation3], 1 }
 0x234   :  { %228 = vsyncpa [#allocation5], 1 }

// kernel: encoder_layer_forward.4
= control target key start
LH: loop header
LB: loop body
LE: loop exit
PB: predicated region body
PF: predicated region fallthrough
CT: control target
= control target key end

     0   :  { %s1006_s15 = smov 0   ;;  %s1008_s16 = smov 0   ;;  %s1181_s0 = inlined_call_operand.vmem [shape: f32[2,1,8], index: 0, kind: input, shape index: {}]   ;;  %s1182_s1 = inlined_call_operand.vmem [shape: bf16[2,8,32], index: 1, kind: input, shape index: {}]   ;;  %s1183_s2 = inlined_call_operand.vmem [shape: bf16[2,8,32], index: 2, kind: input, shape index: {}]   ;;  %s1184_s3 = inlined_call_operand.vmem [shape: bf16[2,8,32], index: 3, kind: input, shape index: {}]   ;;  %s1185_s4 = inlined_call_operand.vmem [shape: bf16[2,8,32], index: 4, kind: output, shape index: {}]  }
   0x1   :  { %s1010_s17 = smov 0  }
   0x2 LB: > { %s33_s18 = sadd.s32 1, %s966_s16  ;;  %p873_p0 = scmp.ge.s32.totalorder %s970_s17, 1  ;;  %s970_s17 = sphi %s1010_s17, %s14_s17   ;;  %s966_s16 = sphi %s1008_s16, %s1187_s16   ;;  %s962_s15 = sphi %s1006_s15, %s1186_s15  }
   0x3   : > { %p35_p1 = scmp.ge.s32.totalorder %s33_s18, 2  ;;  %p228_p2 = scmp.lt.s32.totalorder %s970_s17, 3 }
   0x5   : > { %s1189_s18 = smov (%p35_p1, %s33_s18), 0  ;;  %p229_p3 = pnand %p873_p0, %p228_p2 }
   0x6   : > { %p278_p4 = scmp.lt.s32.totalorder (!%p229_p3), %s962_s15, 1  ;;  %s975_s29 = smov (!%p229_p3), 120  }
   0x7   : > { %232 = sbr.rel (%p229_p3) target bundleno = 1195 (0x4ab), region = 36  ;;  %s976_s30 = smov (!%p229_p3), 112  }
   0x8   : > { %s977_s5 = smov (!%p229_p3), 104   ;;  %s978_s9 = smov (!%p229_p3), 8  }
   0x9   : > { %s979_s10 = smov (!%p229_p3), 16   ;;  %s980_s11 = smov (!%p229_p3), 24  }
   0xc   : > { %s1191_s15 = smov (!%p278_p4, %s962_s15), 1  ;;  %vm337_vm0 = vcmask 64512   ;;  %vm317_vm1 = vcmask 7168   ;;  %v972_v3 = vmov -inf   ;;  %v973_v4 = vmov 0.0  }
   0xd   : > { %s1024_s19 = sshll.u32 %s1191_s15, 2  ;;  %318 = vst.msk [vmem:[#allocation2] sm:$0xff] %vm317_vm1, %v972_v3  ;;  %s283_s28 = scalar_lea.vmem %s1181_s0, %s1191_s15  ;;  %v974_v15 = vmov 0   ;;  %vm385_vm3 = vcmask 1043456   ;;  %vm326_vm4 = vcmask 261120   ;;  %vm506_vm5 = vcmask 130112  }
   0xe   : > { %s1030_s22 = scalar_lea.vmem %s1183_s2, %s1024_s19  ;;  %s1038_s25 = scalar_lea.vmem %s1182_s1, %s1024_s19  ;;  %319 = vst.msk [vmem:[#allocation2 + $0x8] sm:$0xff] %vm317_vm1, %v972_v3  ;;  %v328_v5 = vld [vmem:[%s283_s28] sm:$0x1]  ;;  %921 = vset.pattern.permute.xlu1 %v974_v15  ;;  %922 = vset.pattern.permute.xlu2 %v974_v15  ;;  %vm603_vm6 = vcmask 195712   ;;  %vm700_vm7 = vcmask 261312   ;;  %vm748_vm8 = vcmask 257024  }
   0xf   : > { %v332_v0 = vld [vmem:[%s1030_s22] sm:$0xf]  ;;  %320 = vst.msk [vmem:[#allocation2 + $0x10] sm:$0xff] %vm317_vm1, %v972_v3  ;;  %vm329_vm2 = vcmp.eq.f32.partialorder %v328_v5, 0.0  ;;  %923 = vset.pattern.permute.xlu0 %v974_v15  ;;  %s1089_s8 = scalar_lea.vmem %s1184_s3, %s1024_s19  ;;  %s311_s14 = scalar_lea.vmem %s1185_s4, %s1024_s19 }
  0x10   : > { %v342_v1 = vsel %vm337_vm0, %v332_v0, 0  ;;  %v331_v2 = vld [vmem:[%s1038_s25] sm:$0xf]  ;;  %321 = vst.msk [vmem:[#allocation2 + $0x18] sm:$0xff] %vm317_vm1, %v972_v3  ;;  %v330_v6 = vsel %vm329_vm2, -1e+09, %v973_v4 }
  0x11   : > { %351 = vmatpush.bf16.xpose.msra.mxu0 %v342_v1  ;;  %322 = vst.msk [vmem:[#allocation3] sm:$0xff] %vm317_vm1, %v973_v4  ;;  %v1058_v7 = vperm.slane %v330_v6, 0  ;;  %v413_v12 = vld [vmem:[%s1030_s22] sm:$0xf] }
  0x12   : > { %323 = vst.msk [vmem:[#allocation3 + $0x8] sm:$0xff] %vm317_vm1, %v973_v4  ;;  %v421_v13 = vunpack.c.l.b16 %v413_v12  ;;  %v510_v16 = vld [vmem:[%s1030_s22] sm:$0xf] }
  0x13   : > { %324 = vst.msk [vmem:[#allocation3 + $0x10] sm:$0xff] %vm317_vm1, %v973_v4  ;;  %v518_v17 = vunpack.c.l.b16 %v510_v16  ;;  %v509_v18 = vld [vmem:[%s1038_s25] sm:$0xf] }
  0x14   : > { %325 = vst.msk [vmem:[#allocation3 + $0x18] sm:$0xff] %vm317_vm1, %v973_v4  ;;  %v422_v14 = vpack.c.b16 %v421_v13, %v421_v13  ;;  %v513_v20 = vunpack.c.l.b16 %v509_v18  ;;  %v606_v22 = vld [vmem:[%s1038_s25] sm:$0xf] }
  0x15   : > { %v519_v19 = vpack.c.b16 %v518_v17, %v518_v17  ;;  %v1068_v23 = vld [vmem:[#allocation2] sm:$0xff]  ;;  %v610_v26 = vunpack.c.l.b16 %v606_v22  ;;  %v445_v5 = vld [vmem:[#allocation2 + $0x8] sm:$0xff]  ;;  %327 = vst.msk [vmem:[#allocation4] sm:$0xff] %vm326_vm4, %v973_v4 }
  0x16   : > { %v514_v21 = vpack.c.b16 %v513_v20, %v513_v20  ;;  %v412_v25 = vld [vmem:[%s1038_s25] sm:$0xf]  ;;  %v542_v17 = vld [vmem:[#allocation2 + $0x10] sm:$0xff] }
  0x17   : > { %520 = vrot.lane.b32.xlu2 %v519_v19, %s976_s30  ;;  %v416_v29 = vunpack.c.l.b16 %v412_v25  ;;  %v611_v30 = vpack.c.b16 %v610_v26, %v610_v26  ;;  %v607_v32 = vld [vmem:[%s1030_s22] sm:$0xf] }
  0x18   : > { %878 = vmatmul.msk.bf16.vlgmr.msra.gmra.mxu0 %vm337_vm0, %v331_v2  ;;  %v615_v33 = vunpack.c.l.b16 %v607_v32  ;;  %v333_v37 = vld [vmem:[%s1089_s8] sm:$0xf] }
  0x19   : > { %v417_v31 = vpack.c.b16 %v416_v29, %v416_v29  ;;  %v387_v38 = vsel %vm385_vm3, %v333_v37, 0  ;;  %v414_v63 = vld [vmem:[%s1089_s8] sm:$0xf] }
  0x1a   : > { %v616_v34 = vpack.c.b16 %v615_v33, %v615_v33  ;;  %396 = vmatpush.bf16.msra.mxu1 %v387_v38  ;;  %v471_v1 = vunpack.c.l.b16 %v414_v63  ;;  %v608_v12 = vld [vmem:[%s1089_s8] sm:$0xf] }
  0x1b   : > { %v665_v15 = vunpack.c.l.b16 %v608_v12 }
  0x1c   : > { %v472_v3 = vpack.c.b16 %v471_v1, %v471_v1  ;;  %v402_v4 = vld [vmem:[#allocation4] sm:$0xff] }
  0x1d   : > { %v666_v19 = vpack.c.b16 %v665_v15, %v665_v15 }
  0x1f   : > { %515 = vrot.lane.b32.xlu2 %v514_v21, %s976_s30 }
  0x27   : > { %612 = vrot.lane.b32.xlu2 %v611_v30, %s977_s5 }
  0x71   : > { %v521_v39 = vpop.permute.xlu2 %520 }
  0x72   : > { %v526_v40 = vsel %vm337_vm0, %v521_v39, 0 }
  0x73   : > { %535 = vmatpush.bf16.xpose.msrb.mxu1 %v526_v40 }
  0x79   : > { %v516_v47 = vpop.permute.xlu2 %515 }
  0x81   : > { %v613_v50 = vpop.permute.xlu2 %612 }
  0x95   : > { %v353_v8 = vpop.f32.mrf.mxu0 }
  0x96   : > { %v354_v9 = vadd.f32 %v353_v8, %v1058_v7  ;;  %v511_v8 = vld [vmem:[%s1089_s8] sm:$0xf] }
  0x98   : > { %v358_v10 = vsel %vm337_vm0, %v354_v9, -inf }
  0x99   : > { %359 = vmax.xlane.f32.xlu0 %v358_v10 }
  0x9d   : > { %v355_v11 = vpop.f32.mrf.mxu0 }
  0x9e   : > { %v1121_v11 = vld [vmem:[#allocation2 + $0x18] sm:$0xff] }
  0xad   : > { %423 = vrot.lane.b32.xlu0 %v422_v14, %s975_s29 }
 0x10c   : > { %v360_v24 = vpop.xlane.xlu0 %359 }
 0x10d   : > { %v1073_v27 = vmax.f32 %v1068_v23, %v360_v24 }
 0x10f   : > { %v362_v28 = vsub.f32 %v1068_v23, %v1073_v27  ;;  %411 = vst.msk [vmem:[#allocation2] sm:$0xff] %vm317_vm1, %v1073_v27  ;;  %367 = vperm.xlu1 %921, %v1073_v27  }
 0x111   : > { %v363_v20 = vmul.f32 1.442695, %v362_v28 }
 0x117   : > { %418 = vrot.lane.b32.xlu1 %v417_v31, %s975_s29 }
 0x11f   : > { %617 = vrot.lane.b32.xlu1 %v616_v34, %s977_s5  ;;  %v424_v35 = vpop.permute.xlu0 %423 }
 0x120   : > { %v429_v36 = vsel %vm337_vm0, %v424_v35, 0 }
 0x121   : > { %438 = vmatpush.bf16.xpose.msra.mxu2 %v429_v36 }
 0x181   : > { %v368_v41 = vpop.permute.xlu1 %367 }
 0x182   : > { %v370_v42 = vsub.f32 %v354_v9, %v368_v41 }
 0x184   : > { %v371_v43 = vmul.f32 1.442695, %v370_v42 }
 0x186   : > { %924 = vpow2.f32 %v371_v43 }
 0x187   : > { %926 = vpow2.f32 %v363_v20 }
 0x189   : > { %v419_v44 = vpop.permute.xlu1 %418 }
 0x18a   : > { %880 = vmatmul.msk.bf16.vlgmr.msra.gmra.mxu2 %vm337_vm0, %v419_v44 }
 0x18c   : > { %v1095_v45 = vpop.eup %924 }
 0x18d   : > { %v381_v46 = vpack.c.bf16 %v1095_v45, %v1095_v45  ;;  %v927_v26 = vpop.eup %926  ;;  %v375_v30 = vsel %vm337_vm0, %v1095_v45, 0.0 }
 0x18f   : > { %879 = vmatmul.msk.bf16.vlgmr.msra.gmra.mxu1 %vm337_vm0, %v381_v46 }
 0x191   : > { %v618_v48 = vpop.permute.xlu1 %617 }
 0x192   : > { %v623_v49 = vsel %vm337_vm0, %v618_v48, 0 }
 0x193   : > { %632 = vmatpush.bf16.xpose.msrb.mxu0 %v623_v49 }
 0x19a   : > { %884 = vmatmul.msk.bf16.vlgmr.msrb.gmra.mxu0 %vm337_vm0, %v613_v50 }
 0x19f   : > { %882 = vmatmul.msk.bf16.vlgmr.msrb.gmra.mxu1 %vm337_vm0, %v516_v47 }
 0x20c   : > { %v1103_v51 = vpop.f32.mrf.mxu1 }
 0x20d   : > { %v440_v52 = vpop.f32.mrf.mxu2 }
 0x20e   : > { %v441_v53 = vadd.f32 %v440_v52, %v1058_v7 }
 0x210   : > { %v446_v54 = vsel %vm337_vm0, %v441_v53, -inf }
 0x211   : > { %447 = vmax.xlane.f32.xlu1 %v446_v54 }
 0x214   : > { %v400_v55 = vpop.f32.mrf.mxu1 }
 0x215   : > { %v442_v56 = vpop.f32.mrf.mxu2 }
 0x216   : > { %v373_v56 = vld [vmem:[#allocation3] sm:$0xff] }
 0x217   : > { %v634_v57 = vpop.f32.mrf.mxu0 }
 0x218   : > { %v1108_v58 = vadd.f32 %v634_v57, %v1058_v7  ;;  %v374_v57 = vmul.f32 %v927_v26, %v373_v56 }
 0x21a   : > { %v640_v59 = vsel %vm337_vm0, %v1108_v58, -inf }
 0x21b   : > { %641 = vmax.xlane.f32.xlu0 %v640_v59 }
 0x21c   : > { %v537_v60 = vpop.f32.mrf.mxu1 }
 0x21d   : > { %v1113_v61 = vadd.f32 %v537_v60, %v1058_v7  ;;  %v568_v7 = vunpack.c.l.b16 %v511_v8  ;;  %v656_v8 = vld [vmem:[#allocation3 + $0x18] sm:$0xff] }
 0x21f   : > { %v543_v62 = vsel %vm337_vm0, %v1113_v61, -inf  ;;  %v636_v0 = vpop.f32.mrf.mxu0  ;;  %v569_v10 = vpack.c.b16 %v568_v7, %v568_v7 }
 0x220   : > { %544 = vmax.xlane.f32.xlu2 %v543_v62  ;;  %v462_v62 = vld [vmem:[#allocation3 + $0x8] sm:$0xff] }
 0x224   : > { %v539_v2 = vpop.f32.mrf.mxu1 }
 0x22a   : > { %473 = vrot.lane.b32.xlu1 %v472_v3, %s975_s29 }
 0x284   : > { %v448_v6 = vpop.xlane.xlu1 %447 }
 0x285   : > { %v449_v9 = vmax.f32 %v445_v5, %v448_v6 }
 0x287   : > { %508 = vst.msk [vmem:[#allocation2 + $0x8] sm:$0xff] %vm317_vm1, %v449_v9  ;;  %455 = vperm.xlu2 %922, %v449_v9   ;;  %v450_v24 = vsub.f32 %v445_v5, %v449_v9 }
 0x289   : > { %v451_v25 = vmul.f32 1.442695, %v450_v24 }
 0x28b   : > { %928 = vpow2.f32 %v451_v25 }
 0x28e   : > { %v642_v13 = vpop.xlane.xlu0 %641 }
 0x28f   : > { %v1125_v14 = vmax.f32 %v1121_v11, %v642_v13  ;;  %570 = vrot.lane.b32.xlu2 %v569_v10, %s976_s30 }
 0x291   : > { %v644_v16 = vsub.f32 %v1121_v11, %v1125_v14  ;;  %702 = vst.msk [vmem:[#allocation2 + $0x18] sm:$0xff] %vm317_vm1, %v1125_v14  ;;  %649 = vperm.xlu1 %921, %v1125_v14   ;;  %v929_v29 = vpop.eup %928 }
 0x292   : > { %v463_v63 = vmul.f32 %v929_v29, %v462_v62 }
 0x293   : > { %v545_v18 = vpop.xlane.xlu2 %544  ;;  %v645_v3 = vmul.f32 1.442695, %v644_v16 }
 0x294   : > { %v546_v21 = vmax.f32 %v542_v17, %v545_v18 }
 0x296   : > { %v547_v22 = vsub.f32 %v542_v17, %v546_v21  ;;  %605 = vst.msk [vmem:[#allocation2 + $0x10] sm:$0xff] %vm317_vm1, %v546_v21  ;;  %552 = vperm.xlu0 %923, %v546_v21  }
 0x297   : > { %667 = vrot.lane.b32.xlu2 %v666_v19, %s977_s5 }
 0x298   : > { %v548_v54 = vmul.f32 1.442695, %v547_v22 }
 0x29c   : > { %v474_v23 = vpop.permute.xlu1 %473 }
 0x29d   : > { %v479_v27 = vsel %vm385_vm3, %v474_v23, 0  ;;  %v559_v23 = vld [vmem:[#allocation3 + $0x10] sm:$0xff] }
 0x29e   : > { %488 = vmatpush.bf16.msra.mxu3 %v479_v27 }
 0x29f   : > { %405 = vperm.xlu2 %922, %v927_v26  }
 0x2a7   : > { %497 = vperm.xlu2 %922, %v929_v29  }
 0x2bb   : > { %376 = vadd.xlane.f32.xlu1 %v375_v30 }
 0x2e1   : > { %v456_v28 = vpop.permute.xlu2 %455 }
 0x2e2   : > { %v458_v31 = vsub.f32 %v441_v53, %v456_v28 }
 0x2e4   : > { %v459_v32 = vmul.f32 1.442695, %v458_v31 }
 0x2e6   : > { %930 = vpow2.f32 %v459_v32 }
 0x2e9   : > { %v571_v33 = vpop.permute.xlu2 %570 }
 0x2ea   : > { %v576_v38 = vsel %vm385_vm3, %v571_v33, 0 }
 0x2eb   : > { %585 = vmatpush.bf16.msrb.mxu3 %v576_v38 }
 0x2ec   : > { %v931_v34 = vpop.eup %930 }
 0x2ed   : > { %v464_v35 = vsel %vm337_vm0, %v931_v34, 0.0  ;;  %v469_v36 = vpack.c.bf16 %v931_v34, %v931_v34 }
 0x2ee   : > { %465 = vadd.xlane.f32.xlu0 %v464_v35 }
 0x2ef   : > { %881 = vmatmul.msk.bf16.vlgmr.msra.gmra.mxu3 %vm337_vm0, %v469_v36 }
 0x2f1   : > { %v668_v37 = vpop.permute.xlu2 %667 }
 0x2f2   : > { %v673_v39 = vsel %vm385_vm3, %v668_v37, 0 }
 0x2f3   : > { %682 = vmatpush.bf16.msrb.mxu2 %v673_v39 }
 0x2f9   : > { %v406_v40 = vpop.permute.xlu2 %405 }
 0x2fa   : > { %v408_v41 = vmul.f32 %v406_v40, %v402_v4 }
 0x2fc   : > { %v409_v42 = vadd.f32 %v408_v41, %v1103_v51 }
 0x2fe   : > { %410 = vst.msk [vmem:[#allocation4] sm:$0xff] %vm337_vm0, %v409_v42 }
 0x301   : > { %v498_v20 = vpop.permute.xlu2 %497 }
 0x303   : > { %v650_v43 = vpop.permute.xlu1 %649 }
 0x304   : > { %v652_v44 = vsub.f32 %v1108_v58, %v650_v43 }
 0x305   : > { %v494_v21 = vld [vmem:[#allocation4] sm:$0xff] }
 0x306   : > { %v653_v45 = vmul.f32 1.442695, %v652_v44  ;;  %v500_v22 = vmul.f32 %v498_v20, %v494_v21 }
 0x308   : > { %932 = vpow2.f32 %v653_v45  ;;  %v553_v46 = vpop.permute.xlu0 %552 }
 0x309   : > { %v555_v47 = vsub.f32 %v1113_v61, %v553_v46 }
 0x30b   : > { %v556_v48 = vmul.f32 1.442695, %v555_v47 }
 0x30d   : > { %934 = vpow2.f32 %v556_v48 }
 0x30e   : > { %v933_v49 = vpop.eup %932  ;;  %936 = vpow2.f32 %v548_v54 }
 0x30f   : > { %v658_v50 = vsel %vm337_vm0, %v933_v49, 0.0  ;;  %v663_v52 = vpack.c.bf16 %v933_v49, %v933_v49 }
 0x310   : > { %659 = vadd.xlane.f32.xlu1 %v658_v50 }
 0x311   : > { %885 = vmatmul.msk.bf16.vlgmr.msrb.gmra.mxu2 %vm337_vm0, %v663_v52 }
 0x313   : > { %v935_v51 = vpop.eup %934 }
 0x314   : > { %v566_v53 = vpack.c.bf16 %v935_v51, %v935_v51  ;;  %v937_v55 = vpop.eup %936  ;;  %v561_v15 = vsel %vm337_vm0, %v935_v51, 0.0 }
 0x315   : > { %v560_v31 = vmul.f32 %v937_v55, %v559_v23 }
 0x316   : > { %883 = vmatmul.msk.bf16.vlgmr.msrb.gmra.mxu3 %vm337_vm0, %v566_v53 }
 0x329   : > { %594 = vperm.xlu1 %921, %v937_v55  }
 0x32e   : > { %v377_v58 = vpop.xlane.xlu1 %376 }
 0x32f   : > { %v378_v59 = vadd.f32 %v377_v58, %v374_v57 }
 0x331   : > { %380 = vst.msk [vmem:[#allocation3] sm:$0xff] %vm317_vm1, %v378_v59 }
 0x338   : > { %v706_v60 = vld [vmem:[#allocation3] sm:$0xff] }
 0x339   : > { %938 = vrcp.f32 %v706_v60 }
 0x33a   : > { %940 = vpow2.f32 %v645_v3 }
 0x33f   : > { %v939_v61 = vpop.eup %938 }
 0x340   : > { %711 = vperm.xlu1 %921, %v939_v61   ;;  %v941_v6 = vpop.eup %940 }
 0x341   : > { %v657_v9 = vmul.f32 %v941_v6, %v656_v8 }
 0x361   : > { %v466_v0 = vpop.xlane.xlu0 %465 }
 0x362   : > { %v467_v1 = vadd.f32 %v466_v0, %v463_v63 }
 0x364   : > { %468 = vst.msk [vmem:[#allocation3 + $0x8] sm:$0xff] %vm317_vm1, %v467_v1 }
 0x36b   : > { %v716_v18 = vld [vmem:[#allocation3 + $0x8] sm:$0xff] }
 0x36c   : > { %942 = vrcp.f32 %v716_v18 }
 0x372   : > { %v490_v2 = vpop.f32.mrf.mxu3  ;;  %v943_v16 = vpop.eup %942 }
 0x373   : > { %502 = vrot.lane.b32.xlu2 %v490_v2, %s978_s9 }
 0x37a   : > { %v492_v5 = vpop.f32.mrf.mxu3 }
 0x383   : > { %v660_v7 = vpop.xlane.xlu1 %659 }
 0x384   : > { %v661_v10 = vadd.f32 %v660_v7, %v657_v9 }
 0x386   : > { %662 = vst.msk [vmem:[#allocation3 + $0x18] sm:$0xff] %vm317_vm1, %v661_v10 }
 0x38d   : > { %v736_v14 = vld [vmem:[#allocation3 + $0x18] sm:$0xff] }
 0x38e   : > { %944 = vrcp.f32 %v736_v14 }
 0x394   : > { %v684_v12 = vpop.f32.mrf.mxu2  ;;  %v945_v19 = vpop.eup %944 }
 0x399   : > { %v587_v13 = vpop.f32.mrf.mxu3 }
 0x39a   : > { %599 = vrot.lane.b32.xlu0 %v587_v13, %s979_s10 }
 0x39b   : > { %v595_v29 = vpop.permute.xlu1 %594 }
 0x39c   : > { %v686_v17 = vpop.f32.mrf.mxu2  ;;  %562 = vadd.xlane.f32.xlu2 %v561_v15 }
 0x3a1   : > { %v589_v11 = vpop.f32.mrf.mxu3 }
 0x3a2   : > { %696 = vrot.lane.b32.xlu0 %v684_v12, %s980_s11 }
 0x3aa   : > { %721 = vperm.xlu0 %923, %v943_v16  }
 0x3b2   : > { %741 = vperm.xlu0 %923, %v945_v19   ;;  %v712_v40 = vpop.permute.xlu1 %711 }
 0x3b4   : > { %691 = vperm.xlu2 %922, %v941_v6  }
 0x3cd   : > { %v503_v24 = vpop.permute.xlu2 %502 }
 0x3ce   : > { %v505_v25 = vadd.f32 %v503_v24, %v500_v22 }
 0x3d0   : > { %507 = vst.msk [vmem:[#allocation4] sm:$0xff] %vm506_vm5, %v505_v25 }
 0x3d7   : > { %v591_v26 = vld [vmem:[#allocation4] sm:$0xff] }
 0x3d8   : > { %v597_v30 = vmul.f32 %v595_v29, %v591_v26 }
 0x40c   : > { %v600_v27 = vpop.permute.xlu0 %599 }
 0x40d   : > { %v602_v28 = vadd.f32 %v600_v27, %v597_v30 }
 0x40f   : > { %604 = vst.msk [vmem:[#allocation4] sm:$0xff] %vm603_vm6, %v602_v28  ;;  %v563_v32 = vpop.xlane.xlu2 %562 }
 0x410   : > { %v564_v33 = vadd.f32 %v563_v32, %v560_v31 }
 0x412   : > { %565 = vst.msk [vmem:[#allocation3 + $0x10] sm:$0xff] %vm317_vm1, %v564_v33 }
 0x414   : > { %v697_v37 = vpop.permute.xlu0 %696 }
 0x416   : > { %v688_v34 = vld [vmem:[#allocation4] sm:$0xff] }
 0x417   : > { %v692_v35 = vpop.permute.xlu2 %691 }
 0x418   : > { %v694_v36 = vmul.f32 %v692_v35, %v688_v34 }
 0x419   : > { %v726_v38 = vld [vmem:[#allocation3 + $0x10] sm:$0xff] }
 0x41a   : > { %v699_v39 = vadd.f32 %v697_v37, %v694_v36  ;;  %946 = vrcp.f32 %v726_v38 }
 0x41c   : > { %701 = vst.msk [vmem:[#allocation4] sm:$0xff] %vm700_vm7, %v699_v39  ;;  %v722_v44 = vpop.permute.xlu0 %721 }
 0x420   : > { %v947_v4 = vpop.eup %946 }
 0x421   : > { %731 = vperm.xlu1 %921, %v947_v4  }
 0x423   : > { %v708_v41 = vld [vmem:[#allocation4] sm:$0xff] }
 0x424   : > { %v714_v42 = vmul.f32 %v712_v40, %v708_v41  ;;  %v742_v49 = vpop.permute.xlu0 %741 }
 0x426   : > { %715 = vst.msk [vmem:[#allocation4] sm:$0xff] %vm337_vm0, %v714_v42 }
 0x42d   : > { %v718_v43 = vld [vmem:[#allocation4] sm:$0xff] }
 0x42e   : > { %v724_v45 = vmul.f32 %v722_v44, %v718_v43 }
 0x430   : > { %725 = vst.msk [vmem:[#allocation4] sm:$0xff] %vm506_vm5, %v724_v45 }
 0x437   : > { %v728_v47 = vld [vmem:[#allocation4] sm:$0xff] }
 0x493   : > { %v732_v46 = vpop.permute.xlu1 %731 }
 0x494   : > { %v734_v48 = vmul.f32 %v732_v46, %v728_v47 }
 0x496   : > { %735 = vst.msk [vmem:[#allocation4] sm:$0xff] %vm603_vm6, %v734_v48 }
 0x49d   : > { %v738_v50 = vld [vmem:[#allocation4] sm:$0xff] }
 0x49e   : > { %v744_v52 = vmul.f32 %v742_v49, %v738_v50 }
 0x4a0   : > { %745 = vst.msk [vmem:[#allocation4] sm:$0xff] %vm700_vm7, %v744_v52 }
 0x4a7   : > { %v746_v51 = vld [vmem:[#allocation4] sm:$0xff] }
 0x4a8   : > { %v747_v53 = vpack.c.bf16 %v746_v51, %v746_v51 }
 0x4aa   : > { %749 = vst.msk [vmem:[%s311_s14] sm:$0xf] %vm748_vm8, %v747_v53 }
 0x4ab PF: > { %s14_s17 = sadd.s32 1, %s970_s17   ;;  %s1186_s15 = smov %s966_s16 }
 0x4ac   : > { %p11_p5 = scmp.ge.s32.totalorder %s14_s17, 4   ;;  %s1187_s16 = smov %s1189_s18 }
 0x4ae   :  { %13 = sbr.rel (!%p11_p5) target bundleno = 2 (0x2), region = 89 }

</bundles_post_ra>
